<compile_context>
chip_gen: v5e
topology: v5e:2x2
jax: 0.10.0
libtpu: 0.0.40
codegen_flags: <defaults>
</compile_context>

<pallas_src>
import math

import jax
import jax.numpy as jnp
from jax.experimental import pallas as pl
from jax.experimental.pallas import tpu as pltpu


# ----------------------------------------------------------------------------
# Pallas kernel: multi-layer LSTM recurrence + final Linear(hidden, 1)
# ----------------------------------------------------------------------------
def lstm_fc_kernel(x_ref, wih_ref, whh_ref, b_ref, wfc_ref, bfc_ref, out_ref,
                   buf, pre, h, c):
    # x_ref   : (T*Bp, H)     padded layer-0 input, time-major, batch padded to Bp
    # wih_ref : (L, H, 4H)    input->gates weights (layer 0 rows >= D_in are zero)
    # whh_ref : (L, H, 4H)    hidden->gates weights
    # b_ref   : (L, 4H)       b_ih + b_hh per layer
    # wfc_ref : (1, H)        final linear weight row
    # bfc_ref : (1,)          final linear bias (SMEM scalar)
    # out_ref : (Bp, 1)
    # buf     : (T*Bp, H)     scratch: current layer's output sequence
    # pre     : (T*Bp, 4H)    scratch: hoisted input->gates pre-activations
    # h, c    : (Bp, H)       scratch hidden / cell state
    TB, H = buf.shape
    Bp = h.shape[0]
    T = TB // Bp
    L = wih_ref.shape[0]

    for l in range(L):                       # static unroll over layers
        src = x_ref if l == 0 else buf       # layer 0 reads the input directly
        wih = wih_ref[l]                     # static slice -> (H, 4H)
        whh = whh_ref[l]                     # static slice -> (H, 4H)

        # Hoisted input->gates matmul for the whole sequence (one big MXU op),
        # bias folded in here, off the serial critical path.
        pre[...] = (jnp.dot(src[...], wih, preferred_element_type=jnp.float32)
                    + b_ref[pl.ds(l, 1), :])

        h[...] = jnp.zeros_like(h)
        c[...] = jnp.zeros_like(c)
        last_layer = (l == L - 1)

        for t in range(T):                   # static unroll over time
            gates = (pre[pl.ds(t * Bp, Bp), :]
                     + jnp.dot(h[...], whh,
                               preferred_element_type=jnp.float32))  # (Bp, 4H)
            # Two full-vreg transcendentals instead of four quarter-vreg ones.
            sig = jax.nn.sigmoid(gates)
            th = jnp.tanh(gates)
            i_g = sig[:, 0 * H:1 * H]
            f_g = sig[:, 1 * H:2 * H]
            g_g = th[:, 2 * H:3 * H]
            o_g = sig[:, 3 * H:4 * H]
            c[...] = f_g * c[...] + i_g * g_g
            h[...] = o_g * jnp.tanh(c[...])
            if not last_layer:
                buf[pl.ds(t * Bp, Bp), :] = h[...]   # next layer's input

    # fc(out[:, -1, :]) on the VPU: elementwise mul + lane reduce + SMEM bias.
    out_ref[...] = (jnp.sum(h[...] * wfc_ref[...], axis=-1, keepdims=True)
                    + bfc_ref[0])


def lstm_model_forward(x, wih, whh, b, wfc, bfc):
    """x: (B, T, D_in) float32.  Returns (B, 1) float32."""
    B, T, D_in = x.shape
    L, H, G = wih.shape

    # Pad batch to the sublane width so vregs are fully occupied.
    Bp = ((B + 7) // 8) * 8

    # Time-major, batch- and feature-padded input, flattened to (T*Bp, H).
    x_pad = jnp.zeros((T, Bp, H), jnp.float32)
    x_pad = x_pad.at[:, :B, :D_in].set(jnp.transpose(x, (1, 0, 2)))
    x_flat = x_pad.reshape(T * Bp, H)

    vmem = pl.BlockSpec(memory_space=pltpu.MemorySpace.VMEM)
    smem = pl.BlockSpec(memory_space=pltpu.MemorySpace.SMEM)

    out = pl.pallas_call(
        lstm_fc_kernel,
        out_shape=jax.ShapeDtypeStruct((Bp, 1), jnp.float32),
        in_specs=[vmem, vmem, vmem, vmem, vmem, smem],
        out_specs=vmem,
        scratch_shapes=[
            pltpu.VMEM((T * Bp, H), jnp.float32),   # layer output sequence
            pltpu.VMEM((T * Bp, G), jnp.float32),   # hoisted pre-gates
            pltpu.VMEM((Bp, H), jnp.float32),       # h
            pltpu.VMEM((Bp, H), jnp.float32),       # c
        ],
    )(x_flat, wih, whh, b, wfc, bfc)
    return out[:B]


# ----------------------------------------------------------------------------
# Deterministic parameter construction (PyTorch-style U(-1/sqrt(H), 1/sqrt(H)))
# ----------------------------------------------------------------------------
def init_params(key, input_size, hidden_size, num_layers):
    H, L, D = hidden_size, num_layers, input_size
    k = 1.0 / math.sqrt(H)
    keys = jax.random.split(key, 4 * L + 2)

    torch_layers = []   # per layer: (w_ih (4H,in), w_hh (4H,H), b_ih, b_hh)
    wih_packed, whh_packed, b_packed = [], [], []
    for l in range(L):
        in_dim = D if l == 0 else H
        w_ih = jax.random.uniform(keys[4 * l + 0], (4 * H, in_dim),
                                  minval=-k, maxval=k, dtype=jnp.float32)
        w_hh = jax.random.uniform(keys[4 * l + 1], (4 * H, H),
                                  minval=-k, maxval=k, dtype=jnp.float32)
        b_ih = jax.random.uniform(keys[4 * l + 2], (4 * H,),
                                  minval=-k, maxval=k, dtype=jnp.float32)
        b_hh = jax.random.uniform(keys[4 * l + 3], (4 * H,),
                                  minval=-k, maxval=k, dtype=jnp.float32)
        torch_layers.append((w_ih, w_hh, b_ih, b_hh))

        # Kernel layout: (H, 4H); layer 0 rows beyond D are zero (matches the
        # zero-padded input features).
        w_ih_t = jnp.zeros((H, 4 * H), jnp.float32).at[:in_dim, :].set(w_ih.T)
        wih_packed.append(w_ih_t)
        whh_packed.append(w_hh.T)
        b_packed.append(b_ih + b_hh)

    w_fc = jax.random.uniform(keys[-2], (1, H), minval=-k, maxval=k,
                              dtype=jnp.float32)
    b_fc = jax.random.uniform(keys[-1], (1,), minval=-k, maxval=k,
                              dtype=jnp.float32)

    kernel_params = (jnp.stack(wih_packed),          # (L, H, 4H)
                     jnp.stack(whh_packed),          # (L, H, 4H)
                     jnp.stack(b_packed),            # (L, 4H)
                     w_fc,                           # (1, H)  row form (VPU fc)
                     b_fc)                           # (1,)    SMEM scalar
    return kernel_params, torch_layers, (w_fc, b_fc)


# ----------------------------------------------------------------------------
# Pure-JAX reference (mirrors torch.nn.LSTM + nn.Linear forward exactly)
# ----------------------------------------------------------------------------
def lstm_reference(x, torch_layers, fc):
    B, T, _ = x.shape
    inp = x
    for (w_ih, w_hh, b_ih, b_hh) in torch_layers:
        H = w_hh.shape[1]
        h = jnp.zeros((B, H), jnp.float32)
        c = jnp.zeros((B, H), jnp.float32)
        outs = []
        for t in range(T):
            gates = inp[:, t, :] @ w_ih.T + b_ih + h @ w_hh.T + b_hh
            i, f, g, o = jnp.split(gates, 4, axis=1)
            i, f, o = jax.nn.sigmoid(i), jax.nn.sigmoid(f), jax.nn.sigmoid(o)
            g = jnp.tanh(g)
            c = f * c + i * g
            h = o * jnp.tanh(c)
            outs.append(h)
        inp = jnp.stack(outs, axis=1)
    w_fc, b_fc = fc
    return inp[:, -1, :] @ w_fc.T + b_fc


if __name__ == "__main__":
    B, T, D_in, H, L = 2, 8, 4, 32, 2

    key = jax.random.PRNGKey(0)
    k_x, k_p = jax.random.split(key)
    x = jax.random.normal(k_x, (B, T, D_in), dtype=jnp.float32)
    # `businfo_unit_id` is unused by the PyTorch forward; pass a dummy.
    businfo_unit_id = jnp.arange(B, dtype=jnp.int32)

    kernel_params, torch_layers, fc = init_params(k_p, D_in, H, L)

    out = lstm_model_forward(x, *kernel_params)
    out = jax.block_until_ready(out)

    ref = lstm_reference(x, torch_layers, fc)
    assert out.shape == (B, 1)
    assert jnp.allclose(out, ref, rtol=1e-3, atol=1e-3), (out, ref)

    print("KERNEL_OK")
</pallas_src>

<mosaic_0001>
module attributes {stable_mosaic.version = 11 : i64} {
  func.func @lstm_fc_kernel(%arg0: memref<64x32xf32, #tpu.memory_space<vmem>>, %arg1: memref<2x32x128xf32, #tpu.memory_space<vmem>>, %arg2: memref<2x32x128xf32, #tpu.memory_space<vmem>>, %arg3: memref<2x128xf32, #tpu.memory_space<vmem>>, %arg4: memref<1x32xf32, #tpu.memory_space<vmem>>, %arg5: memref<1xf32, #tpu.memory_space<smem>>, %arg6: memref<8x1xf32, #tpu.memory_space<vmem>>, %arg7: memref<64x32xf32, #tpu.memory_space<vmem>>, %arg8: memref<64x128xf32, #tpu.memory_space<vmem>>, %arg9: memref<8x32xf32, #tpu.memory_space<vmem>>, %arg10: memref<8x32xf32, #tpu.memory_space<vmem>>) attributes {dimension_semantics = [], scalar_prefetch = 0 : i64, scratch_operands = 4 : i64, tpu.core_type = #tpu.core_type<tc>} {
    %c0 = arith.constant 0 : index
    %c0_0 = arith.constant 0 : index
    %c0_1 = arith.constant 0 : index
    %0 = vector.load %arg1[%c0, %c0_0, %c0_1] : memref<2x32x128xf32, #tpu.memory_space<vmem>>, vector<1x32x128xf32>
    %1 = vector.shape_cast %0 : vector<1x32x128xf32> to vector<32x128xf32>
    %c0_2 = arith.constant 0 : index
    %c0_3 = arith.constant 0 : index
    %c0_4 = arith.constant 0 : index
    %2 = vector.load %arg2[%c0_2, %c0_3, %c0_4] : memref<2x32x128xf32, #tpu.memory_space<vmem>>, vector<1x32x128xf32>
    %3 = vector.shape_cast %2 : vector<1x32x128xf32> to vector<32x128xf32>
    %c0_5 = arith.constant 0 : index
    %c0_6 = arith.constant 0 : index
    %4 = vector.load %arg0[%c0_5, %c0_6] : memref<64x32xf32, #tpu.memory_space<vmem>>, vector<64x32xf32>
    %cst = arith.constant dense<0.000000e+00> : vector<64x128xf32>
    %5 = tpu.matmul %4, %1, %cst {dimension_numbers = #tpu.dot_dimension_numbers<[1], [0], [0], [1], [0, 0, 1, 1], [], []>} : vector<64x32xf32>, vector<32x128xf32>, vector<64x128xf32> -> vector<64x128xf32>
    %c0_7 = arith.constant 0 : index
    %c0_8 = arith.constant 0 : index
    %6 = vector.load %arg3[%c0_7, %c0_8] : memref<2x128xf32, #tpu.memory_space<vmem>>, vector<1x128xf32>
    %7 = vector.broadcast %6 : vector<1x128xf32> to vector<64x128xf32>
    %8 = arith.addf %5, %7 : vector<64x128xf32>
    %c0_9 = arith.constant 0 : index
    %c0_10 = arith.constant 0 : index
    %9 = vector.load %arg8[%c0_9, %c0_10] : memref<64x128xf32, #tpu.memory_space<vmem>>, vector<64x128xf32>
    tpu.vector_store %arg8[%c0_9, %c0_10], %8 {strides = array<i32>} : memref<64x128xf32, #tpu.memory_space<vmem>>, vector<64x128xf32>,
    %cst_11 = arith.constant 0.000000e+00 : f32
    %10 = vector.broadcast %cst_11 : f32 to vector<8x32xf32>
    %c0_12 = arith.constant 0 : index
    %c0_13 = arith.constant 0 : index
    %11 = vector.load %arg9[%c0_12, %c0_13] : memref<8x32xf32, #tpu.memory_space<vmem>>, vector<8x32xf32>
    tpu.vector_store %arg9[%c0_12, %c0_13], %10 {strides = array<i32>} : memref<8x32xf32, #tpu.memory_space<vmem>>, vector<8x32xf32>,
    %cst_14 = arith.constant 0.000000e+00 : f32
    %12 = vector.broadcast %cst_14 : f32 to vector<8x32xf32>
    %c0_15 = arith.constant 0 : index
    %c0_16 = arith.constant 0 : index
    %13 = vector.load %arg10[%c0_15, %c0_16] : memref<8x32xf32, #tpu.memory_space<vmem>>, vector<8x32xf32>
    tpu.vector_store %arg10[%c0_15, %c0_16], %12 {strides = array<i32>} : memref<8x32xf32, #tpu.memory_space<vmem>>, vector<8x32xf32>,
    %c0_17 = arith.constant 0 : index
    %c0_18 = arith.constant 0 : index
    %14 = vector.load %arg8[%c0_17, %c0_18] : memref<64x128xf32, #tpu.memory_space<vmem>>, vector<8x128xf32>
    %c0_19 = arith.constant 0 : index
    %c0_20 = arith.constant 0 : index
    %15 = vector.load %arg9[%c0_19, %c0_20] : memref<8x32xf32, #tpu.memory_space<vmem>>, vector<8x32xf32>
    %cst_21 = arith.constant dense<0.000000e+00> : vector<8x128xf32>
    %16 = tpu.matmul %15, %3, %cst_21 {dimension_numbers = #tpu.dot_dimension_numbers<[1], [0], [0], [1], [0, 0, 1, 1], [], []>} : vector<8x32xf32>, vector<32x128xf32>, vector<8x128xf32> -> vector<8x128xf32>
    %17 = arith.addf %14, %16 : vector<8x128xf32>
    %18 = arith.negf %17 : vector<8x128xf32>
    %19 = math.exp %18 : vector<8x128xf32>
    %cst_22 = arith.constant 1.000000e+00 : f32
    %20 = vector.broadcast %cst_22 : f32 to vector<8x128xf32>
    %21 = arith.addf %20, %19 : vector<8x128xf32>
    %22 = arith.divf %20, %21 : vector<8x128xf32>
    %23 = math.tanh %17 : vector<8x128xf32>
    %24 = vector.extract_strided_slice %22 {offsets = [0, 0], sizes = [8, 32], strides = [1, 1]} : vector<8x128xf32> to vector<8x32xf32>
    %25 = vector.extract_strided_slice %22 {offsets = [0, 32], sizes = [8, 32], strides = [1, 1]} : vector<8x128xf32> to vector<8x32xf32>
    %26 = vector.extract_strided_slice %23 {offsets = [0, 64], sizes = [8, 32], strides = [1, 1]} : vector<8x128xf32> to vector<8x32xf32>
    %27 = vector.extract_strided_slice %22 {offsets = [0, 96], sizes = [8, 32], strides = [1, 1]} : vector<8x128xf32> to vector<8x32xf32>
    %c0_23 = arith.constant 0 : index
    %c0_24 = arith.constant 0 : index
    %28 = vector.load %arg10[%c0_23, %c0_24] : memref<8x32xf32, #tpu.memory_space<vmem>>, vector<8x32xf32>
    %29 = arith.mulf %25, %28 : vector<8x32xf32>
    %30 = arith.mulf %24, %26 : vector<8x32xf32>
    %31 = arith.addf %29, %30 : vector<8x32xf32>
    %c0_25 = arith.constant 0 : index
    %c0_26 = arith.constant 0 : index
    %32 = vector.load %arg10[%c0_25, %c0_26] : memref<8x32xf32, #tpu.memory_space<vmem>>, vector<8x32xf32>
    tpu.vector_store %arg10[%c0_25, %c0_26], %31 {strides = array<i32>} : memref<8x32xf32, #tpu.memory_space<vmem>>, vector<8x32xf32>,
    %c0_27 = arith.constant 0 : index
    %c0_28 = arith.constant 0 : index
    %33 = vector.load %arg10[%c0_27, %c0_28] : memref<8x32xf32, #tpu.memory_space<vmem>>, vector<8x32xf32>
    %34 = math.tanh %33 : vector<8x32xf32>
    %35 = arith.mulf %27, %34 : vector<8x32xf32>
    %c0_29 = arith.constant 0 : index
    %c0_30 = arith.constant 0 : index
    %36 = vector.load %arg9[%c0_29, %c0_30] : memref<8x32xf32, #tpu.memory_space<vmem>>, vector<8x32xf32>
    tpu.vector_store %arg9[%c0_29, %c0_30], %35 {strides = array<i32>} : memref<8x32xf32, #tpu.memory_space<vmem>>, vector<8x32xf32>,
    %c0_31 = arith.constant 0 : index
    %c0_32 = arith.constant 0 : index
    %37 = vector.load %arg9[%c0_31, %c0_32] : memref<8x32xf32, #tpu.memory_space<vmem>>, vector<8x32xf32>
    %c0_33 = arith.constant 0 : index
    %c0_34 = arith.constant 0 : index
    %38 = vector.load %arg7[%c0_33, %c0_34] : memref<64x32xf32, #tpu.memory_space<vmem>>, vector<8x32xf32>
    tpu.vector_store %arg7[%c0_33, %c0_34], %37 {strides = array<i32>} : memref<64x32xf32, #tpu.memory_space<vmem>>, vector<8x32xf32>,
    %c8 = arith.constant 8 : index
    %c0_35 = arith.constant 0 : index
    %39 = vector.load %arg8[%c8, %c0_35] : memref<64x128xf32, #tpu.memory_space<vmem>>, vector<8x128xf32>
    %c0_36 = arith.constant 0 : index
    %c0_37 = arith.constant 0 : index
    %40 = vector.load %arg9[%c0_36, %c0_37] : memref<8x32xf32, #tpu.memory_space<vmem>>, vector<8x32xf32>
    %cst_38 = arith.constant dense<0.000000e+00> : vector<8x128xf32>
    %41 = tpu.matmul %40, %3, %cst_38 {dimension_numbers = #tpu.dot_dimension_numbers<[1], [0], [0], [1], [0, 0, 1, 1], [], []>} : vector<8x32xf32>, vector<32x128xf32>, vector<8x128xf32> -> vector<8x128xf32>
    %42 = arith.addf %39, %41 : vector<8x128xf32>
    %43 = arith.negf %42 : vector<8x128xf32>
    %44 = math.exp %43 : vector<8x128xf32>
    %cst_39 = arith.constant 1.000000e+00 : f32
    %45 = vector.broadcast %cst_39 : f32 to vector<8x128xf32>
    %46 = arith.addf %45, %44 : vector<8x128xf32>
    %47 = arith.divf %45, %46 : vector<8x128xf32>
    %48 = math.tanh %42 : vector<8x128xf32>
    %49 = vector.extract_strided_slice %47 {offsets = [0, 0], sizes = [8, 32], strides = [1, 1]} : vector<8x128xf32> to vector<8x32xf32>
    %50 = vector.extract_strided_slice %47 {offsets = [0, 32], sizes = [8, 32], strides = [1, 1]} : vector<8x128xf32> to vector<8x32xf32>
    %51 = vector.extract_strided_slice %48 {offsets = [0, 64], sizes = [8, 32], strides = [1, 1]} : vector<8x128xf32> to vector<8x32xf32>
    %52 = vector.extract_strided_slice %47 {offsets = [0, 96], sizes = [8, 32], strides = [1, 1]} : vector<8x128xf32> to vector<8x32xf32>
    %c0_40 = arith.constant 0 : index
    %c0_41 = arith.constant 0 : index
    %53 = vector.load %arg10[%c0_40, %c0_41] : memref<8x32xf32, #tpu.memory_space<vmem>>, vector<8x32xf32>
    %54 = arith.mulf %50, %53 : vector<8x32xf32>
    %55 = arith.mulf %49, %51 : vector<8x32xf32>
    %56 = arith.addf %54, %55 : vector<8x32xf32>
    %c0_42 = arith.constant 0 : index
    %c0_43 = arith.constant 0 : index
    %57 = vector.load %arg10[%c0_42, %c0_43] : memref<8x32xf32, #tpu.memory_space<vmem>>, vector<8x32xf32>
    tpu.vector_store %arg10[%c0_42, %c0_43], %56 {strides = array<i32>} : memref<8x32xf32, #tpu.memory_space<vmem>>, vector<8x32xf32>,
    %c0_44 = arith.constant 0 : index
    %c0_45 = arith.constant 0 : index
    %58 = vector.load %arg10[%c0_44, %c0_45] : memref<8x32xf32, #tpu.memory_space<vmem>>, vector<8x32xf32>
    %59 = math.tanh %58 : vector<8x32xf32>
    %60 = arith.mulf %52, %59 : vector<8x32xf32>
    %c0_46 = arith.constant 0 : index
    %c0_47 = arith.constant 0 : index
    %61 = vector.load %arg9[%c0_46, %c0_47] : memref<8x32xf32, #tpu.memory_space<vmem>>, vector<8x32xf32>
    tpu.vector_store %arg9[%c0_46, %c0_47], %60 {strides = array<i32>} : memref<8x32xf32, #tpu.memory_space<vmem>>, vector<8x32xf32>,
    %c0_48 = arith.constant 0 : index
    %c0_49 = arith.constant 0 : index
    %62 = vector.load %arg9[%c0_48, %c0_49] : memref<8x32xf32, #tpu.memory_space<vmem>>, vector<8x32xf32>
    %c8_50 = arith.constant 8 : index
    %c0_51 = arith.constant 0 : index
    %63 = vector.load %arg7[%c8_50, %c0_51] : memref<64x32xf32, #tpu.memory_space<vmem>>, vector<8x32xf32>
    tpu.vector_store %arg7[%c8_50, %c0_51], %62 {strides = array<i32>} : memref<64x32xf32, #tpu.memory_space<vmem>>, vector<8x32xf32>,
    %c16 = arith.constant 16 : index
    %c0_52 = arith.constant 0 : index
    %64 = vector.load %arg8[%c16, %c0_52] : memref<64x128xf32, #tpu.memory_space<vmem>>, vector<8x128xf32>
    %c0_53 = arith.constant 0 : index
    %c0_54 = arith.constant 0 : index
    %65 = vector.load %arg9[%c0_53, %c0_54] : memref<8x32xf32, #tpu.memory_space<vmem>>, vector<8x32xf32>
    %cst_55 = arith.constant dense<0.000000e+00> : vector<8x128xf32>
    %66 = tpu.matmul %65, %3, %cst_55 {dimension_numbers = #tpu.dot_dimension_numbers<[1], [0], [0], [1], [0, 0, 1, 1], [], []>} : vector<8x32xf32>, vector<32x128xf32>, vector<8x128xf32> -> vector<8x128xf32>
    %67 = arith.addf %64, %66 : vector<8x128xf32>
    %68 = arith.negf %67 : vector<8x128xf32>
    %69 = math.exp %68 : vector<8x128xf32>
    %cst_56 = arith.constant 1.000000e+00 : f32
    %70 = vector.broadcast %cst_56 : f32 to vector<8x128xf32>
    %71 = arith.addf %70, %69 : vector<8x128xf32>
    %72 = arith.divf %70, %71 : vector<8x128xf32>
    %73 = math.tanh %67 : vector<8x128xf32>
    %74 = vector.extract_strided_slice %72 {offsets = [0, 0], sizes = [8, 32], strides = [1, 1]} : vector<8x128xf32> to vector<8x32xf32>
    %75 = vector.extract_strided_slice %72 {offsets = [0, 32], sizes = [8, 32], strides = [1, 1]} : vector<8x128xf32> to vector<8x32xf32>
    %76 = vector.extract_strided_slice %73 {offsets = [0, 64], sizes = [8, 32], strides = [1, 1]} : vector<8x128xf32> to vector<8x32xf32>
    %77 = vector.extract_strided_slice %72 {offsets = [0, 96], sizes = [8, 32], strides = [1, 1]} : vector<8x128xf32> to vector<8x32xf32>
    %c0_57 = arith.constant 0 : index
    %c0_58 = arith.constant 0 : index
    %78 = vector.load %arg10[%c0_57, %c0_58] : memref<8x32xf32, #tpu.memory_space<vmem>>, vector<8x32xf32>
    %79 = arith.mulf %75, %78 : vector<8x32xf32>
    %80 = arith.mulf %74, %76 : vector<8x32xf32>
    %81 = arith.addf %79, %80 : vector<8x32xf32>
    %c0_59 = arith.constant 0 : index
    %c0_60 = arith.constant 0 : index
    %82 = vector.load %arg10[%c0_59, %c0_60] : memref<8x32xf32, #tpu.memory_space<vmem>>, vector<8x32xf32>
    tpu.vector_store %arg10[%c0_59, %c0_60], %81 {strides = array<i32>} : memref<8x32xf32, #tpu.memory_space<vmem>>, vector<8x32xf32>,
    %c0_61 = arith.constant 0 : index
    %c0_62 = arith.constant 0 : index
    %83 = vector.load %arg10[%c0_61, %c0_62] : memref<8x32xf32, #tpu.memory_space<vmem>>, vector<8x32xf32>
    %84 = math.tanh %83 : vector<8x32xf32>
    %85 = arith.mulf %77, %84 : vector<8x32xf32>
    %c0_63 = arith.constant 0 : index
    %c0_64 = arith.constant 0 : index
    %86 = vector.load %arg9[%c0_63, %c0_64] : memref<8x32xf32, #tpu.memory_space<vmem>>, vector<8x32xf32>
    tpu.vector_store %arg9[%c0_63, %c0_64], %85 {strides = array<i32>} : memref<8x32xf32, #tpu.memory_space<vmem>>, vector<8x32xf32>,
    %c0_65 = arith.constant 0 : index
    %c0_66 = arith.constant 0 : index
    %87 = vector.load %arg9[%c0_65, %c0_66] : memref<8x32xf32, #tpu.memory_space<vmem>>, vector<8x32xf32>
    %c16_67 = arith.constant 16 : index
    %c0_68 = arith.constant 0 : index
    %88 = vector.load %arg7[%c16_67, %c0_68] : memref<64x32xf32, #tpu.memory_space<vmem>>, vector<8x32xf32>
    tpu.vector_store %arg7[%c16_67, %c0_68], %87 {strides = array<i32>} : memref<64x32xf32, #tpu.memory_space<vmem>>, vector<8x32xf32>,
    %c24 = arith.constant 24 : index
    %c0_69 = arith.constant 0 : index
    %89 = vector.load %arg8[%c24, %c0_69] : memref<64x128xf32, #tpu.memory_space<vmem>>, vector<8x128xf32>
    %c0_70 = arith.constant 0 : index
    %c0_71 = arith.constant 0 : index
    %90 = vector.load %arg9[%c0_70, %c0_71] : memref<8x32xf32, #tpu.memory_space<vmem>>, vector<8x32xf32>
    %cst_72 = arith.constant dense<0.000000e+00> : vector<8x128xf32>
    %91 = tpu.matmul %90, %3, %cst_72 {dimension_numbers = #tpu.dot_dimension_numbers<[1], [0], [0], [1], [0, 0, 1, 1], [], []>} : vector<8x32xf32>, vector<32x128xf32>, vector<8x128xf32> -> vector<8x128xf32>
    %92 = arith.addf %89, %91 : vector<8x128xf32>
    %93 = arith.negf %92 : vector<8x128xf32>
    %94 = math.exp %93 : vector<8x128xf32>
    %cst_73 = arith.constant 1.000000e+00 : f32
    %95 = vector.broadcast %cst_73 : f32 to vector<8x128xf32>
    %96 = arith.addf %95, %94 : vector<8x128xf32>
    %97 = arith.divf %95, %96 : vector<8x128xf32>
    %98 = math.tanh %92 : vector<8x128xf32>
    %99 = vector.extract_strided_slice %97 {offsets = [0, 0], sizes = [8, 32], strides = [1, 1]} : vector<8x128xf32> to vector<8x32xf32>
    %100 = vector.extract_strided_slice %97 {offsets = [0, 32], sizes = [8, 32], strides = [1, 1]} : vector<8x128xf32> to vector<8x32xf32>
    %101 = vector.extract_strided_slice %98 {offsets = [0, 64], sizes = [8, 32], strides = [1, 1]} : vector<8x128xf32> to vector<8x32xf32>
    %102 = vector.extract_strided_slice %97 {offsets = [0, 96], sizes = [8, 32], strides = [1, 1]} : vector<8x128xf32> to vector<8x32xf32>
    %c0_74 = arith.constant 0 : index
    %c0_75 = arith.constant 0 : index
    %103 = vector.load %arg10[%c0_74, %c0_75] : memref<8x32xf32, #tpu.memory_space<vmem>>, vector<8x32xf32>
    %104 = arith.mulf %100, %103 : vector<8x32xf32>
    %105 = arith.mulf %99, %101 : vector<8x32xf32>
    %106 = arith.addf %104, %105 : vector<8x32xf32>
    %c0_76 = arith.constant 0 : index
    %c0_77 = arith.constant 0 : index
    %107 = vector.load %arg10[%c0_76, %c0_77] : memref<8x32xf32, #tpu.memory_space<vmem>>, vector<8x32xf32>
    tpu.vector_store %arg10[%c0_76, %c0_77], %106 {strides = array<i32>} : memref<8x32xf32, #tpu.memory_space<vmem>>, vector<8x32xf32>,
    %c0_78 = arith.constant 0 : index
    %c0_79 = arith.constant 0 : index
    %108 = vector.load %arg10[%c0_78, %c0_79] : memref<8x32xf32, #tpu.memory_space<vmem>>, vector<8x32xf32>
    %109 = math.tanh %108 : vector<8x32xf32>
    %110 = arith.mulf %102, %109 : vector<8x32xf32>
    %c0_80 = arith.constant 0 : index
    %c0_81 = arith.constant 0 : index
    %111 = vector.load %arg9[%c0_80, %c0_81] : memref<8x32xf32, #tpu.memory_space<vmem>>, vector<8x32xf32>
    tpu.vector_store %arg9[%c0_80, %c0_81], %110 {strides = array<i32>} : memref<8x32xf32, #tpu.memory_space<vmem>>, vector<8x32xf32>,
    %c0_82 = arith.constant 0 : index
    %c0_83 = arith.constant 0 : index
    %112 = vector.load %arg9[%c0_82, %c0_83] : memref<8x32xf32, #tpu.memory_space<vmem>>, vector<8x32xf32>
    %c24_84 = arith.constant 24 : index
    %c0_85 = arith.constant 0 : index
    %113 = vector.load %arg7[%c24_84, %c0_85] : memref<64x32xf32, #tpu.memory_space<vmem>>, vector<8x32xf32>
    tpu.vector_store %arg7[%c24_84, %c0_85], %112 {strides = array<i32>} : memref<64x32xf32, #tpu.memory_space<vmem>>, vector<8x32xf32>,
    %c32 = arith.constant 32 : index
    %c0_86 = arith.constant 0 : index
    %114 = vector.load %arg8[%c32, %c0_86] : memref<64x128xf32, #tpu.memory_space<vmem>>, vector<8x128xf32>
    %c0_87 = arith.constant 0 : index
    %c0_88 = arith.constant 0 : index
    %115 = vector.load %arg9[%c0_87, %c0_88] : memref<8x32xf32, #tpu.memory_space<vmem>>, vector<8x32xf32>
    %cst_89 = arith.constant dense<0.000000e+00> : vector<8x128xf32>
    %116 = tpu.matmul %115, %3, %cst_89 {dimension_numbers = #tpu.dot_dimension_numbers<[1], [0], [0], [1], [0, 0, 1, 1], [], []>} : vector<8x32xf32>, vector<32x128xf32>, vector<8x128xf32> -> vector<8x128xf32>
    %117 = arith.addf %114, %116 : vector<8x128xf32>
    %118 = arith.negf %117 : vector<8x128xf32>
    %119 = math.exp %118 : vector<8x128xf32>
    %cst_90 = arith.constant 1.000000e+00 : f32
    %120 = vector.broadcast %cst_90 : f32 to vector<8x128xf32>
    %121 = arith.addf %120, %119 : vector<8x128xf32>
    %122 = arith.divf %120, %121 : vector<8x128xf32>
    %123 = math.tanh %117 : vector<8x128xf32>
    %124 = vector.extract_strided_slice %122 {offsets = [0, 0], sizes = [8, 32], strides = [1, 1]} : vector<8x128xf32> to vector<8x32xf32>
    %125 = vector.extract_strided_slice %122 {offsets = [0, 32], sizes = [8, 32], strides = [1, 1]} : vector<8x128xf32> to vector<8x32xf32>
    %126 = vector.extract_strided_slice %123 {offsets = [0, 64], sizes = [8, 32], strides = [1, 1]} : vector<8x128xf32> to vector<8x32xf32>
    %127 = vector.extract_strided_slice %122 {offsets = [0, 96], sizes = [8, 32], strides = [1, 1]} : vector<8x128xf32> to vector<8x32xf32>
    %c0_91 = arith.constant 0 : index
    %c0_92 = arith.constant 0 : index
    %128 = vector.load %arg10[%c0_91, %c0_92] : memref<8x32xf32, #tpu.memory_space<vmem>>, vector<8x32xf32>
    %129 = arith.mulf %125, %128 : vector<8x32xf32>
    %130 = arith.mulf %124, %126 : vector<8x32xf32>
    %131 = arith.addf %129, %130 : vector<8x32xf32>
    %c0_93 = arith.constant 0 : index
    %c0_94 = arith.constant 0 : index
    %132 = vector.load %arg10[%c0_93, %c0_94] : memref<8x32xf32, #tpu.memory_space<vmem>>, vector<8x32xf32>
    tpu.vector_store %arg10[%c0_93, %c0_94], %131 {strides = array<i32>} : memref<8x32xf32, #tpu.memory_space<vmem>>, vector<8x32xf32>,
    %c0_95 = arith.constant 0 : index
    %c0_96 = arith.constant 0 : index
    %133 = vector.load %arg10[%c0_95, %c0_96] : memref<8x32xf32, #tpu.memory_space<vmem>>, vector<8x32xf32>
    %134 = math.tanh %133 : vector<8x32xf32>
    %135 = arith.mulf %127, %134 : vector<8x32xf32>
    %c0_97 = arith.constant 0 : index
    %c0_98 = arith.constant 0 : index
    %136 = vector.load %arg9[%c0_97, %c0_98] : memref<8x32xf32, #tpu.memory_space<vmem>>, vector<8x32xf32>
    tpu.vector_store %arg9[%c0_97, %c0_98], %135 {strides = array<i32>} : memref<8x32xf32, #tpu.memory_space<vmem>>, vector<8x32xf32>,
    %c0_99 = arith.constant 0 : index
    %c0_100 = arith.constant 0 : index
    %137 = vector.load %arg9[%c0_99, %c0_100] : memref<8x32xf32, #tpu.memory_space<vmem>>, vector<8x32xf32>
    %c32_101 = arith.constant 32 : index
    %c0_102 = arith.constant 0 : index
    %138 = vector.load %arg7[%c32_101, %c0_102] : memref<64x32xf32, #tpu.memory_space<vmem>>, vector<8x32xf32>
    tpu.vector_store %arg7[%c32_101, %c0_102], %137 {strides = array<i32>} : memref<64x32xf32, #tpu.memory_space<vmem>>, vector<8x32xf32>,
    %c40 = arith.constant 40 : index
    %c0_103 = arith.constant 0 : index
    %139 = vector.load %arg8[%c40, %c0_103] : memref<64x128xf32, #tpu.memory_space<vmem>>, vector<8x128xf32>
    %c0_104 = arith.constant 0 : index
    %c0_105 = arith.constant 0 : index
    %140 = vector.load %arg9[%c0_104, %c0_105] : memref<8x32xf32, #tpu.memory_space<vmem>>, vector<8x32xf32>
    %cst_106 = arith.constant dense<0.000000e+00> : vector<8x128xf32>
    %141 = tpu.matmul %140, %3, %cst_106 {dimension_numbers = #tpu.dot_dimension_numbers<[1], [0], [0], [1], [0, 0, 1, 1], [], []>} : vector<8x32xf32>, vector<32x128xf32>, vector<8x128xf32> -> vector<8x128xf32>
    %142 = arith.addf %139, %141 : vector<8x128xf32>
    %143 = arith.negf %142 : vector<8x128xf32>
    %144 = math.exp %143 : vector<8x128xf32>
    %cst_107 = arith.constant 1.000000e+00 : f32
    %145 = vector.broadcast %cst_107 : f32 to vector<8x128xf32>
    %146 = arith.addf %145, %144 : vector<8x128xf32>
    %147 = arith.divf %145, %146 : vector<8x128xf32>
    %148 = math.tanh %142 : vector<8x128xf32>
    %149 = vector.extract_strided_slice %147 {offsets = [0, 0], sizes = [8, 32], strides = [1, 1]} : vector<8x128xf32> to vector<8x32xf32>
    %150 = vector.extract_strided_slice %147 {offsets = [0, 32], sizes = [8, 32], strides = [1, 1]} : vector<8x128xf32> to vector<8x32xf32>
    %151 = vector.extract_strided_slice %148 {offsets = [0, 64], sizes = [8, 32], strides = [1, 1]} : vector<8x128xf32> to vector<8x32xf32>
    %152 = vector.extract_strided_slice %147 {offsets = [0, 96], sizes = [8, 32], strides = [1, 1]} : vector<8x128xf32> to vector<8x32xf32>
    %c0_108 = arith.constant 0 : index
    %c0_109 = arith.constant 0 : index
    %153 = vector.load %arg10[%c0_108, %c0_109] : memref<8x32xf32, #tpu.memory_space<vmem>>, vector<8x32xf32>
    %154 = arith.mulf %150, %153 : vector<8x32xf32>
    %155 = arith.mulf %149, %151 : vector<8x32xf32>
    %156 = arith.addf %154, %155 : vector<8x32xf32>
    %c0_110 = arith.constant 0 : index
    %c0_111 = arith.constant 0 : index
    %157 = vector.load %arg10[%c0_110, %c0_111] : memref<8x32xf32, #tpu.memory_space<vmem>>, vector<8x32xf32>
    tpu.vector_store %arg10[%c0_110, %c0_111], %156 {strides = array<i32>} : memref<8x32xf32, #tpu.memory_space<vmem>>, vector<8x32xf32>,
    %c0_112 = arith.constant 0 : index
    %c0_113 = arith.constant 0 : index
    %158 = vector.load %arg10[%c0_112, %c0_113] : memref<8x32xf32, #tpu.memory_space<vmem>>, vector<8x32xf32>
    %159 = math.tanh %158 : vector<8x32xf32>
    %160 = arith.mulf %152, %159 : vector<8x32xf32>
    %c0_114 = arith.constant 0 : index
    %c0_115 = arith.constant 0 : index
    %161 = vector.load %arg9[%c0_114, %c0_115] : memref<8x32xf32, #tpu.memory_space<vmem>>, vector<8x32xf32>
    tpu.vector_store %arg9[%c0_114, %c0_115], %160 {strides = array<i32>} : memref<8x32xf32, #tpu.memory_space<vmem>>, vector<8x32xf32>,
    %c0_116 = arith.constant 0 : index
    %c0_117 = arith.constant 0 : index
    %162 = vector.load %arg9[%c0_116, %c0_117] : memref<8x32xf32, #tpu.memory_space<vmem>>, vector<8x32xf32>
    %c40_118 = arith.constant 40 : index
    %c0_119 = arith.constant 0 : index
    %163 = vector.load %arg7[%c40_118, %c0_119] : memref<64x32xf32, #tpu.memory_space<vmem>>, vector<8x32xf32>
    tpu.vector_store %arg7[%c40_118, %c0_119], %162 {strides = array<i32>} : memref<64x32xf32, #tpu.memory_space<vmem>>, vector<8x32xf32>,
    %c48 = arith.constant 48 : index
    %c0_120 = arith.constant 0 : index
    %164 = vector.load %arg8[%c48, %c0_120] : memref<64x128xf32, #tpu.memory_space<vmem>>, vector<8x128xf32>
    %c0_121 = arith.constant 0 : index
    %c0_122 = arith.constant 0 : index
    %165 = vector.load %arg9[%c0_121, %c0_122] : memref<8x32xf32, #tpu.memory_space<vmem>>, vector<8x32xf32>
    %cst_123 = arith.constant dense<0.000000e+00> : vector<8x128xf32>
    %166 = tpu.matmul %165, %3, %cst_123 {dimension_numbers = #tpu.dot_dimension_numbers<[1], [0], [0], [1], [0, 0, 1, 1], [], []>} : vector<8x32xf32>, vector<32x128xf32>, vector<8x128xf32> -> vector<8x128xf32>
    %167 = arith.addf %164, %166 : vector<8x128xf32>
    %168 = arith.negf %167 : vector<8x128xf32>
    %169 = math.exp %168 : vector<8x128xf32>
    %cst_124 = arith.constant 1.000000e+00 : f32
    %170 = vector.broadcast %cst_124 : f32 to vector<8x128xf32>
    %171 = arith.addf %170, %169 : vector<8x128xf32>
    %172 = arith.divf %170, %171 : vector<8x128xf32>
    %173 = math.tanh %167 : vector<8x128xf32>
    %174 = vector.extract_strided_slice %172 {offsets = [0, 0], sizes = [8, 32], strides = [1, 1]} : vector<8x128xf32> to vector<8x32xf32>
    %175 = vector.extract_strided_slice %172 {offsets = [0, 32], sizes = [8, 32], strides = [1, 1]} : vector<8x128xf32> to vector<8x32xf32>
    %176 = vector.extract_strided_slice %173 {offsets = [0, 64], sizes = [8, 32], strides = [1, 1]} : vector<8x128xf32> to vector<8x32xf32>
    %177 = vector.extract_strided_slice %172 {offsets = [0, 96], sizes = [8, 32], strides = [1, 1]} : vector<8x128xf32> to vector<8x32xf32>
    %c0_125 = arith.constant 0 : index
    %c0_126 = arith.constant 0 : index
    %178 = vector.load %arg10[%c0_125, %c0_126] : memref<8x32xf32, #tpu.memory_space<vmem>>, vector<8x32xf32>
    %179 = arith.mulf %175, %178 : vector<8x32xf32>
    %180 = arith.mulf %174, %176 : vector<8x32xf32>
    %181 = arith.addf %179, %180 : vector<8x32xf32>
    %c0_127 = arith.constant 0 : index
    %c0_128 = arith.constant 0 : index
    %182 = vector.load %arg10[%c0_127, %c0_128] : memref<8x32xf32, #tpu.memory_space<vmem>>, vector<8x32xf32>
    tpu.vector_store %arg10[%c0_127, %c0_128], %181 {strides = array<i32>} : memref<8x32xf32, #tpu.memory_space<vmem>>, vector<8x32xf32>,
    %c0_129 = arith.constant 0 : index
    %c0_130 = arith.constant 0 : index
    %183 = vector.load %arg10[%c0_129, %c0_130] : memref<8x32xf32, #tpu.memory_space<vmem>>, vector<8x32xf32>
    %184 = math.tanh %183 : vector<8x32xf32>
    %185 = arith.mulf %177, %184 : vector<8x32xf32>
    %c0_131 = arith.constant 0 : index
    %c0_132 = arith.constant 0 : index
    %186 = vector.load %arg9[%c0_131, %c0_132] : memref<8x32xf32, #tpu.memory_space<vmem>>, vector<8x32xf32>
    tpu.vector_store %arg9[%c0_131, %c0_132], %185 {strides = array<i32>} : memref<8x32xf32, #tpu.memory_space<vmem>>, vector<8x32xf32>,
    %c0_133 = arith.constant 0 : index
    %c0_134 = arith.constant 0 : index
    %187 = vector.load %arg9[%c0_133, %c0_134] : memref<8x32xf32, #tpu.memory_space<vmem>>, vector<8x32xf32>
    %c48_135 = arith.constant 48 : index
    %c0_136 = arith.constant 0 : index
    %188 = vector.load %arg7[%c48_135, %c0_136] : memref<64x32xf32, #tpu.memory_space<vmem>>, vector<8x32xf32>
    tpu.vector_store %arg7[%c48_135, %c0_136], %187 {strides = array<i32>} : memref<64x32xf32, #tpu.memory_space<vmem>>, vector<8x32xf32>,
    %c56 = arith.constant 56 : index
    %c0_137 = arith.constant 0 : index
    %189 = vector.load %arg8[%c56, %c0_137] : memref<64x128xf32, #tpu.memory_space<vmem>>, vector<8x128xf32>
    %c0_138 = arith.constant 0 : index
    %c0_139 = arith.constant 0 : index
    %190 = vector.load %arg9[%c0_138, %c0_139] : memref<8x32xf32, #tpu.memory_space<vmem>>, vector<8x32xf32>
    %cst_140 = arith.constant dense<0.000000e+00> : vector<8x128xf32>
    %191 = tpu.matmul %190, %3, %cst_140 {dimension_numbers = #tpu.dot_dimension_numbers<[1], [0], [0], [1], [0, 0, 1, 1], [], []>} : vector<8x32xf32>, vector<32x128xf32>, vector<8x128xf32> -> vector<8x128xf32>
    %192 = arith.addf %189, %191 : vector<8x128xf32>
    %193 = arith.negf %192 : vector<8x128xf32>
    %194 = math.exp %193 : vector<8x128xf32>
    %cst_141 = arith.constant 1.000000e+00 : f32
    %195 = vector.broadcast %cst_141 : f32 to vector<8x128xf32>
    %196 = arith.addf %195, %194 : vector<8x128xf32>
    %197 = arith.divf %195, %196 : vector<8x128xf32>
    %198 = math.tanh %192 : vector<8x128xf32>
    %199 = vector.extract_strided_slice %197 {offsets = [0, 0], sizes = [8, 32], strides = [1, 1]} : vector<8x128xf32> to vector<8x32xf32>
    %200 = vector.extract_strided_slice %197 {offsets = [0, 32], sizes = [8, 32], strides = [1, 1]} : vector<8x128xf32> to vector<8x32xf32>
    %201 = vector.extract_strided_slice %198 {offsets = [0, 64], sizes = [8, 32], strides = [1, 1]} : vector<8x128xf32> to vector<8x32xf32>
    %202 = vector.extract_strided_slice %197 {offsets = [0, 96], sizes = [8, 32], strides = [1, 1]} : vector<8x128xf32> to vector<8x32xf32>
    %c0_142 = arith.constant 0 : index
    %c0_143 = arith.constant 0 : index
    %203 = vector.load %arg10[%c0_142, %c0_143] : memref<8x32xf32, #tpu.memory_space<vmem>>, vector<8x32xf32>
    %204 = arith.mulf %200, %203 : vector<8x32xf32>
    %205 = arith.mulf %199, %201 : vector<8x32xf32>
    %206 = arith.addf %204, %205 : vector<8x32xf32>
    %c0_144 = arith.constant 0 : index
    %c0_145 = arith.constant 0 : index
    %207 = vector.load %arg10[%c0_144, %c0_145] : memref<8x32xf32, #tpu.memory_space<vmem>>, vector<8x32xf32>
    tpu.vector_store %arg10[%c0_144, %c0_145], %206 {strides = array<i32>} : memref<8x32xf32, #tpu.memory_space<vmem>>, vector<8x32xf32>,
    %c0_146 = arith.constant 0 : index
    %c0_147 = arith.constant 0 : index
    %208 = vector.load %arg10[%c0_146, %c0_147] : memref<8x32xf32, #tpu.memory_space<vmem>>, vector<8x32xf32>
    %209 = math.tanh %208 : vector<8x32xf32>
    %210 = arith.mulf %202, %209 : vector<8x32xf32>
    %c0_148 = arith.constant 0 : index
    %c0_149 = arith.constant 0 : index
    %211 = vector.load %arg9[%c0_148, %c0_149] : memref<8x32xf32, #tpu.memory_space<vmem>>, vector<8x32xf32>
    tpu.vector_store %arg9[%c0_148, %c0_149], %210 {strides = array<i32>} : memref<8x32xf32, #tpu.memory_space<vmem>>, vector<8x32xf32>,
    %c0_150 = arith.constant 0 : index
    %c0_151 = arith.constant 0 : index
    %212 = vector.load %arg9[%c0_150, %c0_151] : memref<8x32xf32, #tpu.memory_space<vmem>>, vector<8x32xf32>
    %c56_152 = arith.constant 56 : index
    %c0_153 = arith.constant 0 : index
    %213 = vector.load %arg7[%c56_152, %c0_153] : memref<64x32xf32, #tpu.memory_space<vmem>>, vector<8x32xf32>
    tpu.vector_store %arg7[%c56_152, %c0_153], %212 {strides = array<i32>} : memref<64x32xf32, #tpu.memory_space<vmem>>, vector<8x32xf32>,
    %c1 = arith.constant 1 : index
    %c0_154 = arith.constant 0 : index
    %c0_155 = arith.constant 0 : index
    %214 = vector.load %arg1[%c1, %c0_154, %c0_155] : memref<2x32x128xf32, #tpu.memory_space<vmem>>, vector<1x32x128xf32>
    %215 = vector.shape_cast %214 : vector<1x32x128xf32> to vector<32x128xf32>
    %c1_156 = arith.constant 1 : index
    %c0_157 = arith.constant 0 : index
    %c0_158 = arith.constant 0 : index
    %216 = vector.load %arg2[%c1_156, %c0_157, %c0_158] : memref<2x32x128xf32, #tpu.memory_space<vmem>>, vector<1x32x128xf32>
    %217 = vector.shape_cast %216 : vector<1x32x128xf32> to vector<32x128xf32>
    %c0_159 = arith.constant 0 : index
    %c0_160 = arith.constant 0 : index
    %218 = vector.load %arg7[%c0_159, %c0_160] : memref<64x32xf32, #tpu.memory_space<vmem>>, vector<64x32xf32>
    %cst_161 = arith.constant dense<0.000000e+00> : vector<64x128xf32>
    %219 = tpu.matmul %218, %215, %cst_161 {dimension_numbers = #tpu.dot_dimension_numbers<[1], [0], [0], [1], [0, 0, 1, 1], [], []>} : vector<64x32xf32>, vector<32x128xf32>, vector<64x128xf32> -> vector<64x128xf32>
    %c1_162 = arith.constant 1 : index
    %c0_163 = arith.constant 0 : index
    %220 = vector.load %arg3[%c1_162, %c0_163] : memref<2x128xf32, #tpu.memory_space<vmem>>, vector<1x128xf32>
    %221 = vector.broadcast %220 : vector<1x128xf32> to vector<64x128xf32>
    %222 = arith.addf %219, %221 : vector<64x128xf32>
    %c0_164 = arith.constant 0 : index
    %c0_165 = arith.constant 0 : index
    %223 = vector.load %arg8[%c0_164, %c0_165] : memref<64x128xf32, #tpu.memory_space<vmem>>, vector<64x128xf32>
    tpu.vector_store %arg8[%c0_164, %c0_165], %222 {strides = array<i32>} : memref<64x128xf32, #tpu.memory_space<vmem>>, vector<64x128xf32>,
    %cst_166 = arith.constant 0.000000e+00 : f32
    %224 = vector.broadcast %cst_166 : f32 to vector<8x32xf32>
    %c0_167 = arith.constant 0 : index
    %c0_168 = arith.constant 0 : index
    %225 = vector.load %arg9[%c0_167, %c0_168] : memref<8x32xf32, #tpu.memory_space<vmem>>, vector<8x32xf32>
    tpu.vector_store %arg9[%c0_167, %c0_168], %224 {strides = array<i32>} : memref<8x32xf32, #tpu.memory_space<vmem>>, vector<8x32xf32>,
    %cst_169 = arith.constant 0.000000e+00 : f32
    %226 = vector.broadcast %cst_169 : f32 to vector<8x32xf32>
    %c0_170 = arith.constant 0 : index
    %c0_171 = arith.constant 0 : index
    %227 = vector.load %arg10[%c0_170, %c0_171] : memref<8x32xf32, #tpu.memory_space<vmem>>, vector<8x32xf32>
    tpu.vector_store %arg10[%c0_170, %c0_171], %226 {strides = array<i32>} : memref<8x32xf32, #tpu.memory_space<vmem>>, vector<8x32xf32>,
    %c0_172 = arith.constant 0 : index
    %c0_173 = arith.constant 0 : index
    %228 = vector.load %arg8[%c0_172, %c0_173] : memref<64x128xf32, #tpu.memory_space<vmem>>, vector<8x128xf32>
    %c0_174 = arith.constant 0 : index
    %c0_175 = arith.constant 0 : index
    %229 = vector.load %arg9[%c0_174, %c0_175] : memref<8x32xf32, #tpu.memory_space<vmem>>, vector<8x32xf32>
    %cst_176 = arith.constant dense<0.000000e+00> : vector<8x128xf32>
    %230 = tpu.matmul %229, %217, %cst_176 {dimension_numbers = #tpu.dot_dimension_numbers<[1], [0], [0], [1], [0, 0, 1, 1], [], []>} : vector<8x32xf32>, vector<32x128xf32>, vector<8x128xf32> -> vector<8x128xf32>
    %231 = arith.addf %228, %230 : vector<8x128xf32>
    %232 = arith.negf %231 : vector<8x128xf32>
    %233 = math.exp %232 : vector<8x128xf32>
    %cst_177 = arith.constant 1.000000e+00 : f32
    %234 = vector.broadcast %cst_177 : f32 to vector<8x128xf32>
    %235 = arith.addf %234, %233 : vector<8x128xf32>
    %236 = arith.divf %234, %235 : vector<8x128xf32>
    %237 = math.tanh %231 : vector<8x128xf32>
    %238 = vector.extract_strided_slice %236 {offsets = [0, 0], sizes = [8, 32], strides = [1, 1]} : vector<8x128xf32> to vector<8x32xf32>
    %239 = vector.extract_strided_slice %236 {offsets = [0, 32], sizes = [8, 32], strides = [1, 1]} : vector<8x128xf32> to vector<8x32xf32>
    %240 = vector.extract_strided_slice %237 {offsets = [0, 64], sizes = [8, 32], strides = [1, 1]} : vector<8x128xf32> to vector<8x32xf32>
    %241 = vector.extract_strided_slice %236 {offsets = [0, 96], sizes = [8, 32], strides = [1, 1]} : vector<8x128xf32> to vector<8x32xf32>
    %c0_178 = arith.constant 0 : index
    %c0_179 = arith.constant 0 : index
    %242 = vector.load %arg10[%c0_178, %c0_179] : memref<8x32xf32, #tpu.memory_space<vmem>>, vector<8x32xf32>
    %243 = arith.mulf %239, %242 : vector<8x32xf32>
    %244 = arith.mulf %238, %240 : vector<8x32xf32>
    %245 = arith.addf %243, %244 : vector<8x32xf32>
    %c0_180 = arith.constant 0 : index
    %c0_181 = arith.constant 0 : index
    %246 = vector.load %arg10[%c0_180, %c0_181] : memref<8x32xf32, #tpu.memory_space<vmem>>, vector<8x32xf32>
    tpu.vector_store %arg10[%c0_180, %c0_181], %245 {strides = array<i32>} : memref<8x32xf32, #tpu.memory_space<vmem>>, vector<8x32xf32>,
    %c0_182 = arith.constant 0 : index
    %c0_183 = arith.constant 0 : index
    %247 = vector.load %arg10[%c0_182, %c0_183] : memref<8x32xf32, #tpu.memory_space<vmem>>, vector<8x32xf32>
    %248 = math.tanh %247 : vector<8x32xf32>
    %249 = arith.mulf %241, %248 : vector<8x32xf32>
    %c0_184 = arith.constant 0 : index
    %c0_185 = arith.constant 0 : index
    %250 = vector.load %arg9[%c0_184, %c0_185] : memref<8x32xf32, #tpu.memory_space<vmem>>, vector<8x32xf32>
    tpu.vector_store %arg9[%c0_184, %c0_185], %249 {strides = array<i32>} : memref<8x32xf32, #tpu.memory_space<vmem>>, vector<8x32xf32>,
    %c8_186 = arith.constant 8 : index
    %c0_187 = arith.constant 0 : index
    %251 = vector.load %arg8[%c8_186, %c0_187] : memref<64x128xf32, #tpu.memory_space<vmem>>, vector<8x128xf32>
    %c0_188 = arith.constant 0 : index
    %c0_189 = arith.constant 0 : index
    %252 = vector.load %arg9[%c0_188, %c0_189] : memref<8x32xf32, #tpu.memory_space<vmem>>, vector<8x32xf32>
    %cst_190 = arith.constant dense<0.000000e+00> : vector<8x128xf32>
    %253 = tpu.matmul %252, %217, %cst_190 {dimension_numbers = #tpu.dot_dimension_numbers<[1], [0], [0], [1], [0, 0, 1, 1], [], []>} : vector<8x32xf32>, vector<32x128xf32>, vector<8x128xf32> -> vector<8x128xf32>
    %254 = arith.addf %251, %253 : vector<8x128xf32>
    %255 = arith.negf %254 : vector<8x128xf32>
    %256 = math.exp %255 : vector<8x128xf32>
    %cst_191 = arith.constant 1.000000e+00 : f32
    %257 = vector.broadcast %cst_191 : f32 to vector<8x128xf32>
    %258 = arith.addf %257, %256 : vector<8x128xf32>
    %259 = arith.divf %257, %258 : vector<8x128xf32>
    %260 = math.tanh %254 : vector<8x128xf32>
    %261 = vector.extract_strided_slice %259 {offsets = [0, 0], sizes = [8, 32], strides = [1, 1]} : vector<8x128xf32> to vector<8x32xf32>
    %262 = vector.extract_strided_slice %259 {offsets = [0, 32], sizes = [8, 32], strides = [1, 1]} : vector<8x128xf32> to vector<8x32xf32>
    %263 = vector.extract_strided_slice %260 {offsets = [0, 64], sizes = [8, 32], strides = [1, 1]} : vector<8x128xf32> to vector<8x32xf32>
    %264 = vector.extract_strided_slice %259 {offsets = [0, 96], sizes = [8, 32], strides = [1, 1]} : vector<8x128xf32> to vector<8x32xf32>
    %c0_192 = arith.constant 0 : index
    %c0_193 = arith.constant 0 : index
    %265 = vector.load %arg10[%c0_192, %c0_193] : memref<8x32xf32, #tpu.memory_space<vmem>>, vector<8x32xf32>
    %266 = arith.mulf %262, %265 : vector<8x32xf32>
    %267 = arith.mulf %261, %263 : vector<8x32xf32>
    %268 = arith.addf %266, %267 : vector<8x32xf32>
    %c0_194 = arith.constant 0 : index
    %c0_195 = arith.constant 0 : index
    %269 = vector.load %arg10[%c0_194, %c0_195] : memref<8x32xf32, #tpu.memory_space<vmem>>, vector<8x32xf32>
    tpu.vector_store %arg10[%c0_194, %c0_195], %268 {strides = array<i32>} : memref<8x32xf32, #tpu.memory_space<vmem>>, vector<8x32xf32>,
    %c0_196 = arith.constant 0 : index
    %c0_197 = arith.constant 0 : index
    %270 = vector.load %arg10[%c0_196, %c0_197] : memref<8x32xf32, #tpu.memory_space<vmem>>, vector<8x32xf32>
    %271 = math.tanh %270 : vector<8x32xf32>
    %272 = arith.mulf %264, %271 : vector<8x32xf32>
    %c0_198 = arith.constant 0 : index
    %c0_199 = arith.constant 0 : index
    %273 = vector.load %arg9[%c0_198, %c0_199] : memref<8x32xf32, #tpu.memory_space<vmem>>, vector<8x32xf32>
    tpu.vector_store %arg9[%c0_198, %c0_199], %272 {strides = array<i32>} : memref<8x32xf32, #tpu.memory_space<vmem>>, vector<8x32xf32>,
    %c16_200 = arith.constant 16 : index
    %c0_201 = arith.constant 0 : index
    %274 = vector.load %arg8[%c16_200, %c0_201] : memref<64x128xf32, #tpu.memory_space<vmem>>, vector<8x128xf32>
    %c0_202 = arith.constant 0 : index
    %c0_203 = arith.constant 0 : index
    %275 = vector.load %arg9[%c0_202, %c0_203] : memref<8x32xf32, #tpu.memory_space<vmem>>, vector<8x32xf32>
    %cst_204 = arith.constant dense<0.000000e+00> : vector<8x128xf32>
    %276 = tpu.matmul %275, %217, %cst_204 {dimension_numbers = #tpu.dot_dimension_numbers<[1], [0], [0], [1], [0, 0, 1, 1], [], []>} : vector<8x32xf32>, vector<32x128xf32>, vector<8x128xf32> -> vector<8x128xf32>
    %277 = arith.addf %274, %276 : vector<8x128xf32>
    %278 = arith.negf %277 : vector<8x128xf32>
    %279 = math.exp %278 : vector<8x128xf32>
    %cst_205 = arith.constant 1.000000e+00 : f32
    %280 = vector.broadcast %cst_205 : f32 to vector<8x128xf32>
    %281 = arith.addf %280, %279 : vector<8x128xf32>
    %282 = arith.divf %280, %281 : vector<8x128xf32>
    %283 = math.tanh %277 : vector<8x128xf32>
    %284 = vector.extract_strided_slice %282 {offsets = [0, 0], sizes = [8, 32], strides = [1, 1]} : vector<8x128xf32> to vector<8x32xf32>
    %285 = vector.extract_strided_slice %282 {offsets = [0, 32], sizes = [8, 32], strides = [1, 1]} : vector<8x128xf32> to vector<8x32xf32>
    %286 = vector.extract_strided_slice %283 {offsets = [0, 64], sizes = [8, 32], strides = [1, 1]} : vector<8x128xf32> to vector<8x32xf32>
    %287 = vector.extract_strided_slice %282 {offsets = [0, 96], sizes = [8, 32], strides = [1, 1]} : vector<8x128xf32> to vector<8x32xf32>
    %c0_206 = arith.constant 0 : index
    %c0_207 = arith.constant 0 : index
    %288 = vector.load %arg10[%c0_206, %c0_207] : memref<8x32xf32, #tpu.memory_space<vmem>>, vector<8x32xf32>
    %289 = arith.mulf %285, %288 : vector<8x32xf32>
    %290 = arith.mulf %284, %286 : vector<8x32xf32>
    %291 = arith.addf %289, %290 : vector<8x32xf32>
    %c0_208 = arith.constant 0 : index
    %c0_209 = arith.constant 0 : index
    %292 = vector.load %arg10[%c0_208, %c0_209] : memref<8x32xf32, #tpu.memory_space<vmem>>, vector<8x32xf32>
    tpu.vector_store %arg10[%c0_208, %c0_209], %291 {strides = array<i32>} : memref<8x32xf32, #tpu.memory_space<vmem>>, vector<8x32xf32>,
    %c0_210 = arith.constant 0 : index
    %c0_211 = arith.constant 0 : index
    %293 = vector.load %arg10[%c0_210, %c0_211] : memref<8x32xf32, #tpu.memory_space<vmem>>, vector<8x32xf32>
    %294 = math.tanh %293 : vector<8x32xf32>
    %295 = arith.mulf %287, %294 : vector<8x32xf32>
    %c0_212 = arith.constant 0 : index
    %c0_213 = arith.constant 0 : index
    %296 = vector.load %arg9[%c0_212, %c0_213] : memref<8x32xf32, #tpu.memory_space<vmem>>, vector<8x32xf32>
    tpu.vector_store %arg9[%c0_212, %c0_213], %295 {strides = array<i32>} : memref<8x32xf32, #tpu.memory_space<vmem>>, vector<8x32xf32>,
    %c24_214 = arith.constant 24 : index
    %c0_215 = arith.constant 0 : index
    %297 = vector.load %arg8[%c24_214, %c0_215] : memref<64x128xf32, #tpu.memory_space<vmem>>, vector<8x128xf32>
    %c0_216 = arith.constant 0 : index
    %c0_217 = arith.constant 0 : index
    %298 = vector.load %arg9[%c0_216, %c0_217] : memref<8x32xf32, #tpu.memory_space<vmem>>, vector<8x32xf32>
    %cst_218 = arith.constant dense<0.000000e+00> : vector<8x128xf32>
    %299 = tpu.matmul %298, %217, %cst_218 {dimension_numbers = #tpu.dot_dimension_numbers<[1], [0], [0], [1], [0, 0, 1, 1], [], []>} : vector<8x32xf32>, vector<32x128xf32>, vector<8x128xf32> -> vector<8x128xf32>
    %300 = arith.addf %297, %299 : vector<8x128xf32>
    %301 = arith.negf %300 : vector<8x128xf32>
    %302 = math.exp %301 : vector<8x128xf32>
    %cst_219 = arith.constant 1.000000e+00 : f32
    %303 = vector.broadcast %cst_219 : f32 to vector<8x128xf32>
    %304 = arith.addf %303, %302 : vector<8x128xf32>
    %305 = arith.divf %303, %304 : vector<8x128xf32>
    %306 = math.tanh %300 : vector<8x128xf32>
    %307 = vector.extract_strided_slice %305 {offsets = [0, 0], sizes = [8, 32], strides = [1, 1]} : vector<8x128xf32> to vector<8x32xf32>
    %308 = vector.extract_strided_slice %305 {offsets = [0, 32], sizes = [8, 32], strides = [1, 1]} : vector<8x128xf32> to vector<8x32xf32>
    %309 = vector.extract_strided_slice %306 {offsets = [0, 64], sizes = [8, 32], strides = [1, 1]} : vector<8x128xf32> to vector<8x32xf32>
    %310 = vector.extract_strided_slice %305 {offsets = [0, 96], sizes = [8, 32], strides = [1, 1]} : vector<8x128xf32> to vector<8x32xf32>
    %c0_220 = arith.constant 0 : index
    %c0_221 = arith.constant 0 : index
    %311 = vector.load %arg10[%c0_220, %c0_221] : memref<8x32xf32, #tpu.memory_space<vmem>>, vector<8x32xf32>
    %312 = arith.mulf %308, %311 : vector<8x32xf32>
    %313 = arith.mulf %307, %309 : vector<8x32xf32>
    %314 = arith.addf %312, %313 : vector<8x32xf32>
    %c0_222 = arith.constant 0 : index
    %c0_223 = arith.constant 0 : index
    %315 = vector.load %arg10[%c0_222, %c0_223] : memref<8x32xf32, #tpu.memory_space<vmem>>, vector<8x32xf32>
    tpu.vector_store %arg10[%c0_222, %c0_223], %314 {strides = array<i32>} : memref<8x32xf32, #tpu.memory_space<vmem>>, vector<8x32xf32>,
    %c0_224 = arith.constant 0 : index
    %c0_225 = arith.constant 0 : index
    %316 = vector.load %arg10[%c0_224, %c0_225] : memref<8x32xf32, #tpu.memory_space<vmem>>, vector<8x32xf32>
    %317 = math.tanh %316 : vector<8x32xf32>
    %318 = arith.mulf %310, %317 : vector<8x32xf32>
    %c0_226 = arith.constant 0 : index
    %c0_227 = arith.constant 0 : index
    %319 = vector.load %arg9[%c0_226, %c0_227] : memref<8x32xf32, #tpu.memory_space<vmem>>, vector<8x32xf32>
    tpu.vector_store %arg9[%c0_226, %c0_227], %318 {strides = array<i32>} : memref<8x32xf32, #tpu.memory_space<vmem>>, vector<8x32xf32>,
    %c32_228 = arith.constant 32 : index
    %c0_229 = arith.constant 0 : index
    %320 = vector.load %arg8[%c32_228, %c0_229] : memref<64x128xf32, #tpu.memory_space<vmem>>, vector<8x128xf32>
    %c0_230 = arith.constant 0 : index
    %c0_231 = arith.constant 0 : index
    %321 = vector.load %arg9[%c0_230, %c0_231] : memref<8x32xf32, #tpu.memory_space<vmem>>, vector<8x32xf32>
    %cst_232 = arith.constant dense<0.000000e+00> : vector<8x128xf32>
    %322 = tpu.matmul %321, %217, %cst_232 {dimension_numbers = #tpu.dot_dimension_numbers<[1], [0], [0], [1], [0, 0, 1, 1], [], []>} : vector<8x32xf32>, vector<32x128xf32>, vector<8x128xf32> -> vector<8x128xf32>
    %323 = arith.addf %320, %322 : vector<8x128xf32>
    %324 = arith.negf %323 : vector<8x128xf32>
    %325 = math.exp %324 : vector<8x128xf32>
    %cst_233 = arith.constant 1.000000e+00 : f32
    %326 = vector.broadcast %cst_233 : f32 to vector<8x128xf32>
    %327 = arith.addf %326, %325 : vector<8x128xf32>
    %328 = arith.divf %326, %327 : vector<8x128xf32>
    %329 = math.tanh %323 : vector<8x128xf32>
    %330 = vector.extract_strided_slice %328 {offsets = [0, 0], sizes = [8, 32], strides = [1, 1]} : vector<8x128xf32> to vector<8x32xf32>
    %331 = vector.extract_strided_slice %328 {offsets = [0, 32], sizes = [8, 32], strides = [1, 1]} : vector<8x128xf32> to vector<8x32xf32>
    %332 = vector.extract_strided_slice %329 {offsets = [0, 64], sizes = [8, 32], strides = [1, 1]} : vector<8x128xf32> to vector<8x32xf32>
    %333 = vector.extract_strided_slice %328 {offsets = [0, 96], sizes = [8, 32], strides = [1, 1]} : vector<8x128xf32> to vector<8x32xf32>
    %c0_234 = arith.constant 0 : index
    %c0_235 = arith.constant 0 : index
    %334 = vector.load %arg10[%c0_234, %c0_235] : memref<8x32xf32, #tpu.memory_space<vmem>>, vector<8x32xf32>
    %335 = arith.mulf %331, %334 : vector<8x32xf32>
    %336 = arith.mulf %330, %332 : vector<8x32xf32>
    %337 = arith.addf %335, %336 : vector<8x32xf32>
    %c0_236 = arith.constant 0 : index
    %c0_237 = arith.constant 0 : index
    %338 = vector.load %arg10[%c0_236, %c0_237] : memref<8x32xf32, #tpu.memory_space<vmem>>, vector<8x32xf32>
    tpu.vector_store %arg10[%c0_236, %c0_237], %337 {strides = array<i32>} : memref<8x32xf32, #tpu.memory_space<vmem>>, vector<8x32xf32>,
    %c0_238 = arith.constant 0 : index
    %c0_239 = arith.constant 0 : index
    %339 = vector.load %arg10[%c0_238, %c0_239] : memref<8x32xf32, #tpu.memory_space<vmem>>, vector<8x32xf32>
    %340 = math.tanh %339 : vector<8x32xf32>
    %341 = arith.mulf %333, %340 : vector<8x32xf32>
    %c0_240 = arith.constant 0 : index
    %c0_241 = arith.constant 0 : index
    %342 = vector.load %arg9[%c0_240, %c0_241] : memref<8x32xf32, #tpu.memory_space<vmem>>, vector<8x32xf32>
    tpu.vector_store %arg9[%c0_240, %c0_241], %341 {strides = array<i32>} : memref<8x32xf32, #tpu.memory_space<vmem>>, vector<8x32xf32>,
    %c40_242 = arith.constant 40 : index
    %c0_243 = arith.constant 0 : index
    %343 = vector.load %arg8[%c40_242, %c0_243] : memref<64x128xf32, #tpu.memory_space<vmem>>, vector<8x128xf32>
    %c0_244 = arith.constant 0 : index
    %c0_245 = arith.constant 0 : index
    %344 = vector.load %arg9[%c0_244, %c0_245] : memref<8x32xf32, #tpu.memory_space<vmem>>, vector<8x32xf32>
    %cst_246 = arith.constant dense<0.000000e+00> : vector<8x128xf32>
    %345 = tpu.matmul %344, %217, %cst_246 {dimension_numbers = #tpu.dot_dimension_numbers<[1], [0], [0], [1], [0, 0, 1, 1], [], []>} : vector<8x32xf32>, vector<32x128xf32>, vector<8x128xf32> -> vector<8x128xf32>
    %346 = arith.addf %343, %345 : vector<8x128xf32>
    %347 = arith.negf %346 : vector<8x128xf32>
    %348 = math.exp %347 : vector<8x128xf32>
    %cst_247 = arith.constant 1.000000e+00 : f32
    %349 = vector.broadcast %cst_247 : f32 to vector<8x128xf32>
    %350 = arith.addf %349, %348 : vector<8x128xf32>
    %351 = arith.divf %349, %350 : vector<8x128xf32>
    %352 = math.tanh %346 : vector<8x128xf32>
    %353 = vector.extract_strided_slice %351 {offsets = [0, 0], sizes = [8, 32], strides = [1, 1]} : vector<8x128xf32> to vector<8x32xf32>
    %354 = vector.extract_strided_slice %351 {offsets = [0, 32], sizes = [8, 32], strides = [1, 1]} : vector<8x128xf32> to vector<8x32xf32>
    %355 = vector.extract_strided_slice %352 {offsets = [0, 64], sizes = [8, 32], strides = [1, 1]} : vector<8x128xf32> to vector<8x32xf32>
    %356 = vector.extract_strided_slice %351 {offsets = [0, 96], sizes = [8, 32], strides = [1, 1]} : vector<8x128xf32> to vector<8x32xf32>
    %c0_248 = arith.constant 0 : index
    %c0_249 = arith.constant 0 : index
    %357 = vector.load %arg10[%c0_248, %c0_249] : memref<8x32xf32, #tpu.memory_space<vmem>>, vector<8x32xf32>
    %358 = arith.mulf %354, %357 : vector<8x32xf32>
    %359 = arith.mulf %353, %355 : vector<8x32xf32>
    %360 = arith.addf %358, %359 : vector<8x32xf32>
    %c0_250 = arith.constant 0 : index
    %c0_251 = arith.constant 0 : index
    %361 = vector.load %arg10[%c0_250, %c0_251] : memref<8x32xf32, #tpu.memory_space<vmem>>, vector<8x32xf32>
    tpu.vector_store %arg10[%c0_250, %c0_251], %360 {strides = array<i32>} : memref<8x32xf32, #tpu.memory_space<vmem>>, vector<8x32xf32>,
    %c0_252 = arith.constant 0 : index
    %c0_253 = arith.constant 0 : index
    %362 = vector.load %arg10[%c0_252, %c0_253] : memref<8x32xf32, #tpu.memory_space<vmem>>, vector<8x32xf32>
    %363 = math.tanh %362 : vector<8x32xf32>
    %364 = arith.mulf %356, %363 : vector<8x32xf32>
    %c0_254 = arith.constant 0 : index
    %c0_255 = arith.constant 0 : index
    %365 = vector.load %arg9[%c0_254, %c0_255] : memref<8x32xf32, #tpu.memory_space<vmem>>, vector<8x32xf32>
    tpu.vector_store %arg9[%c0_254, %c0_255], %364 {strides = array<i32>} : memref<8x32xf32, #tpu.memory_space<vmem>>, vector<8x32xf32>,
    %c48_256 = arith.constant 48 : index
    %c0_257 = arith.constant 0 : index
    %366 = vector.load %arg8[%c48_256, %c0_257] : memref<64x128xf32, #tpu.memory_space<vmem>>, vector<8x128xf32>
    %c0_258 = arith.constant 0 : index
    %c0_259 = arith.constant 0 : index
    %367 = vector.load %arg9[%c0_258, %c0_259] : memref<8x32xf32, #tpu.memory_space<vmem>>, vector<8x32xf32>
    %cst_260 = arith.constant dense<0.000000e+00> : vector<8x128xf32>
    %368 = tpu.matmul %367, %217, %cst_260 {dimension_numbers = #tpu.dot_dimension_numbers<[1], [0], [0], [1], [0, 0, 1, 1], [], []>} : vector<8x32xf32>, vector<32x128xf32>, vector<8x128xf32> -> vector<8x128xf32>
    %369 = arith.addf %366, %368 : vector<8x128xf32>
    %370 = arith.negf %369 : vector<8x128xf32>
    %371 = math.exp %370 : vector<8x128xf32>
    %cst_261 = arith.constant 1.000000e+00 : f32
    %372 = vector.broadcast %cst_261 : f32 to vector<8x128xf32>
    %373 = arith.addf %372, %371 : vector<8x128xf32>
    %374 = arith.divf %372, %373 : vector<8x128xf32>
    %375 = math.tanh %369 : vector<8x128xf32>
    %376 = vector.extract_strided_slice %374 {offsets = [0, 0], sizes = [8, 32], strides = [1, 1]} : vector<8x128xf32> to vector<8x32xf32>
    %377 = vector.extract_strided_slice %374 {offsets = [0, 32], sizes = [8, 32], strides = [1, 1]} : vector<8x128xf32> to vector<8x32xf32>
    %378 = vector.extract_strided_slice %375 {offsets = [0, 64], sizes = [8, 32], strides = [1, 1]} : vector<8x128xf32> to vector<8x32xf32>
    %379 = vector.extract_strided_slice %374 {offsets = [0, 96], sizes = [8, 32], strides = [1, 1]} : vector<8x128xf32> to vector<8x32xf32>
    %c0_262 = arith.constant 0 : index
    %c0_263 = arith.constant 0 : index
    %380 = vector.load %arg10[%c0_262, %c0_263] : memref<8x32xf32, #tpu.memory_space<vmem>>, vector<8x32xf32>
    %381 = arith.mulf %377, %380 : vector<8x32xf32>
    %382 = arith.mulf %376, %378 : vector<8x32xf32>
    %383 = arith.addf %381, %382 : vector<8x32xf32>
    %c0_264 = arith.constant 0 : index
    %c0_265 = arith.constant 0 : index
    %384 = vector.load %arg10[%c0_264, %c0_265] : memref<8x32xf32, #tpu.memory_space<vmem>>, vector<8x32xf32>
    tpu.vector_store %arg10[%c0_264, %c0_265], %383 {strides = array<i32>} : memref<8x32xf32, #tpu.memory_space<vmem>>, vector<8x32xf32>,
    %c0_266 = arith.constant 0 : index
    %c0_267 = arith.constant 0 : index
    %385 = vector.load %arg10[%c0_266, %c0_267] : memref<8x32xf32, #tpu.memory_space<vmem>>, vector<8x32xf32>
    %386 = math.tanh %385 : vector<8x32xf32>
    %387 = arith.mulf %379, %386 : vector<8x32xf32>
    %c0_268 = arith.constant 0 : index
    %c0_269 = arith.constant 0 : index
    %388 = vector.load %arg9[%c0_268, %c0_269] : memref<8x32xf32, #tpu.memory_space<vmem>>, vector<8x32xf32>
    tpu.vector_store %arg9[%c0_268, %c0_269], %387 {strides = array<i32>} : memref<8x32xf32, #tpu.memory_space<vmem>>, vector<8x32xf32>,
    %c56_270 = arith.constant 56 : index
    %c0_271 = arith.constant 0 : index
    %389 = vector.load %arg8[%c56_270, %c0_271] : memref<64x128xf32, #tpu.memory_space<vmem>>, vector<8x128xf32>
    %c0_272 = arith.constant 0 : index
    %c0_273 = arith.constant 0 : index
    %390 = vector.load %arg9[%c0_272, %c0_273] : memref<8x32xf32, #tpu.memory_space<vmem>>, vector<8x32xf32>
    %cst_274 = arith.constant dense<0.000000e+00> : vector<8x128xf32>
    %391 = tpu.matmul %390, %217, %cst_274 {dimension_numbers = #tpu.dot_dimension_numbers<[1], [0], [0], [1], [0, 0, 1, 1], [], []>} : vector<8x32xf32>, vector<32x128xf32>, vector<8x128xf32> -> vector<8x128xf32>
    %392 = arith.addf %389, %391 : vector<8x128xf32>
    %393 = arith.negf %392 : vector<8x128xf32>
    %394 = math.exp %393 : vector<8x128xf32>
    %cst_275 = arith.constant 1.000000e+00 : f32
    %395 = vector.broadcast %cst_275 : f32 to vector<8x128xf32>
    %396 = arith.addf %395, %394 : vector<8x128xf32>
    %397 = arith.divf %395, %396 : vector<8x128xf32>
    %398 = math.tanh %392 : vector<8x128xf32>
    %399 = vector.extract_strided_slice %397 {offsets = [0, 0], sizes = [8, 32], strides = [1, 1]} : vector<8x128xf32> to vector<8x32xf32>
    %400 = vector.extract_strided_slice %397 {offsets = [0, 32], sizes = [8, 32], strides = [1, 1]} : vector<8x128xf32> to vector<8x32xf32>
    %401 = vector.extract_strided_slice %398 {offsets = [0, 64], sizes = [8, 32], strides = [1, 1]} : vector<8x128xf32> to vector<8x32xf32>
    %402 = vector.extract_strided_slice %397 {offsets = [0, 96], sizes = [8, 32], strides = [1, 1]} : vector<8x128xf32> to vector<8x32xf32>
    %c0_276 = arith.constant 0 : index
    %c0_277 = arith.constant 0 : index
    %403 = vector.load %arg10[%c0_276, %c0_277] : memref<8x32xf32, #tpu.memory_space<vmem>>, vector<8x32xf32>
    %404 = arith.mulf %400, %403 : vector<8x32xf32>
    %405 = arith.mulf %399, %401 : vector<8x32xf32>
    %406 = arith.addf %404, %405 : vector<8x32xf32>
    %c0_278 = arith.constant 0 : index
    %c0_279 = arith.constant 0 : index
    %407 = vector.load %arg10[%c0_278, %c0_279] : memref<8x32xf32, #tpu.memory_space<vmem>>, vector<8x32xf32>
    tpu.vector_store %arg10[%c0_278, %c0_279], %406 {strides = array<i32>} : memref<8x32xf32, #tpu.memory_space<vmem>>, vector<8x32xf32>,
    %c0_280 = arith.constant 0 : index
    %c0_281 = arith.constant 0 : index
    %408 = vector.load %arg10[%c0_280, %c0_281] : memref<8x32xf32, #tpu.memory_space<vmem>>, vector<8x32xf32>
    %409 = math.tanh %408 : vector<8x32xf32>
    %410 = arith.mulf %402, %409 : vector<8x32xf32>
    %c0_282 = arith.constant 0 : index
    %c0_283 = arith.constant 0 : index
    %411 = vector.load %arg9[%c0_282, %c0_283] : memref<8x32xf32, #tpu.memory_space<vmem>>, vector<8x32xf32>
    tpu.vector_store %arg9[%c0_282, %c0_283], %410 {strides = array<i32>} : memref<8x32xf32, #tpu.memory_space<vmem>>, vector<8x32xf32>,
    %c0_284 = arith.constant 0 : index
    %c0_285 = arith.constant 0 : index
    %412 = vector.load %arg9[%c0_284, %c0_285] : memref<8x32xf32, #tpu.memory_space<vmem>>, vector<8x32xf32>
    %c0_286 = arith.constant 0 : index
    %c0_287 = arith.constant 0 : index
    %413 = vector.load %arg4[%c0_286, %c0_287] : memref<1x32xf32, #tpu.memory_space<vmem>>, vector<1x32xf32>
    %414 = vector.broadcast %413 : vector<1x32xf32> to vector<8x32xf32>
    %415 = arith.mulf %412, %414 : vector<8x32xf32>
    %cst_288 = arith.constant dense<0.000000e+00> : vector<8xf32>
    %416 = vector.multi_reduction <add>, %415, %cst_288 [1] : vector<8x32xf32> to vector<8xf32>
    %417 = vector.shape_cast %416 : vector<8xf32> to vector<8x1xf32>
    %c0_289 = arith.constant 0 : index
    %418 = memref.load %arg5[%c0_289] : memref<1xf32, #tpu.memory_space<smem>>
    %419 = vector.broadcast %418 : f32 to vector<8x1xf32>
    %420 = arith.addf %417, %419 : vector<8x1xf32>
    %c0_290 = arith.constant 0 : index
    %c0_291 = arith.constant 0 : index
    %421 = vector.load %arg6[%c0_290, %c0_291] : memref<8x1xf32, #tpu.memory_space<vmem>>, vector<8x1xf32>
    tpu.vector_store %arg6[%c0_290, %c0_291], %420 {strides = array<i32>} : memref<8x1xf32, #tpu.memory_space<vmem>>, vector<8x1xf32>,
    return
  }
}

</mosaic_0001>

<bundles_post_ra>
// kernel: tpu_custom_call.1
= control target key start
LH: loop header
LB: loop body
LE: loop exit
PB: predicated region body
PF: predicated region fallthrough
CT: control target
= control target key end

     0   :  { %12 = vsyncpa [#allocation8], 0  ;;  %s1744_s24 = smov [#allocation7]   ;;  %s1745_s26 = smov 128   ;;  %s2129_s0 = inlined_call_operand.vmem [shape: f32[64,32], index: 0, kind: input, shape index: {}]   ;;  %s2130_s1 = inlined_call_operand.vmem [shape: f32[2,32,128], index: 1, kind: input, shape index: {}]   ;;  %s2131_s2 = inlined_call_operand.hbm [shape: f32[2,32,128], index: 2, kind: input, shape index: {}]   ;;  %s2132_s3 = inlined_call_operand.vmem [shape: f32[2,128], index: 3, kind: input, shape index: {}]   ;;  %s2133_s4 = inlined_call_operand.vmem [shape: f32[1,32], index: 4, kind: input, shape index: {}]   ;;  %s2134_s5 = inlined_call_operand.<no memory space> [shape: f32[1], index: 5, kind: input, shape index: {}]   ;;  %s2135_s6 = inlined_call_operand.vmem [shape: f32[8,1], index: 6, kind: output, shape index: {}]  }
   0x1   :  { %s21_s23 = sshll.u32 %s2131_s2, 4  ;;  %s23_s25 = sshll.u32 %s1744_s24, 4  ;;  %s22_s23 = int_to_ptr.hbm [resolvable:$true] %s21_s23  ;;  %s24_s25 = int_to_ptr.vmem [resolvable:$true] %s23_s25 }
   0x2   :  { %s1746_s27 = smov 8  }
   0x3   :  { %29 = dma.hbm_to_vmem [thread:$0]  %s22_s23, 1024, %s24_s25, [#allocation8], %s1745_s26, %s1745_s26, %s1746_s27  }
   0x4   :  { %1742 = dma.done.wait [#allocation8], 1024  }
   0x5   :  { %1743 = vsyncadd [#allocation8], 4294966272  ;;  %vm58_vm0 = vcmask 261120   ;;  %v1747_v0 = vmov 0.0   ;;  %v43_v1 = vld [vmem:[%s2130_s1 + $0x18] sm:$0xff]  ;;  %v42_v2 = vld [vmem:[%s2130_s1 + $0x10] sm:$0xff] }
   0x6   :  { %132 = vst.msk [vmem:[#allocation4] sm:$0xff] %vm58_vm0, %v1747_v0  ;;  %v1799_v3 = vld [vmem:[#allocation7 + $0x18] sm:$0xff]  ;;  %95 = vmatpush.msra.mxu0 %v43_v1  ;;  %v1802_v4 = vld [vmem:[#allocation7 + $0x10] sm:$0xff]  ;;  %v1807_v6 = vld [vmem:[#allocation7 + $0x8] sm:$0xff]  ;;  %s1748_s15 = smov 64   ;;  %s1749_s16 = smov 32  }
   0x7   :  { %133 = vst.msk [vmem:[#allocation5] sm:$0xff] %vm58_vm0, %v1747_v0  ;;  %151 = vmatpush.msra.mxu1 %v1799_v3  ;;  %v41_v5 = vld [vmem:[%s2130_s1 + $0x8] sm:$0xff]  ;;  %232 = vmatpush.msra.mxu2 %v1799_v3  ;;  %v40_v7 = vld [vmem:[%s2130_s1] sm:$0xff]  ;;  %v1814_v8 = vld [vmem:[#allocation7] sm:$0xff]  ;;  %s1750_s17 = smov 96  }
   0x8   :  { %96 = vmatpush.msra.mxu0 %v42_v2  ;;  %v48_v9 = vld [vmem:[%s2129_s0] sm:$0xff]  ;;  %v1555_v42 = vld [vmem:[%s2130_s1 + $0x38] sm:$0xff]  ;;  %v1554_v43 = vld [vmem:[%s2130_s1 + $0x30] sm:$0xff] }
   0x9   :  { %152 = vmatpush.msra.mxu1 %v1802_v4  ;;  %233 = vmatpush.msra.mxu2 %v1802_v4  ;;  %v1841_v11 = vld [vmem:[%s2132_s3] ss:$0 sm:$0xff]  ;;  %v49_v44 = vld [vmem:[%s2129_s0 + $0x8] sm:$0xff] }
   0xa   :  { %97 = vmatpush.msra.mxu0 %v41_v5  ;;  %838 = vmatpush.msra.mxu3 %v1555_v42  ;;  %v1553_v45 = vld [vmem:[%s2130_s1 + $0x28] sm:$0xff]  ;;  %v1552_v46 = vld [vmem:[%s2130_s1 + $0x20] sm:$0xff] }
   0xb   :  { %153 = vmatpush.msra.mxu1 %v1807_v6  ;;  %234 = vmatpush.msra.mxu2 %v1807_v6 }
   0xc   :  { %98 = vmatpush.msra.mxu0 %v40_v7  ;;  %839 = vmatpush.msra.mxu3 %v1554_v43 }
   0xd   :  { %v135_v10 = vld [vmem:[#allocation4] sm:$0xff]  ;;  %154 = vmatpush.msra.mxu1 %v1814_v8  ;;  %1528 = vmatmul.msk.f32.vlgmr.msra.gmra.mxu0 %vm58_vm0, %v48_v9 }
   0xe   :  { %1536 = vmatmul.msk.f32.vlgmr.msra.gmra.mxu1 %vm58_vm0, %v135_v10  ;;  %235 = vmatpush.msra.mxu2 %v1814_v8  ;;  %v180_v17 = vld [vmem:[#allocation5] sm:$0xff] }
   0xf   :  { %313 = vmatpush.msrb.mxu1 %v1799_v3  ;;  %840 = vmatpush.msra.mxu3 %v1553_v45 }
  0x10   :  { %475 = vmatpush.msrb.mxu2 %v1799_v3 }
  0x11   :  { %314 = vmatpush.msrb.mxu1 %v1802_v4  ;;  %841 = vmatpush.msra.mxu3 %v1552_v46 }
  0x12   :  { %476 = vmatpush.msrb.mxu2 %v1802_v4 }
  0x13   :  { %315 = vmatpush.msrb.mxu1 %v1807_v6 }
  0x14   :  { %477 = vmatpush.msrb.mxu2 %v1807_v6 }
  0x15   :  { %316 = vmatpush.msrb.mxu1 %v1814_v8  ;;  %1529 = vmatmul.msk.f32.gmra.mxu0 %vm58_vm0, %v49_v44 }
  0x16   :  { %478 = vmatpush.msrb.mxu2 %v1814_v8 }
  0x17   :  { %394 = vmatpush.msra.mxu1 %v1799_v3 }
  0x19   :  { %395 = vmatpush.msra.mxu1 %v1802_v4 }
  0x1b   :  { %396 = vmatpush.msra.mxu1 %v1807_v6 }
  0x1d   :  { %397 = vmatpush.msra.mxu1 %v1814_v8 }
  0x8a   :  { %v100_v12 = vpop.f32.mrf.mxu0 }
  0x8b   :  { %v156_v13 = vpop.f32.mrf.mxu1  ;;  %v101_v14 = vadd.f32 %v1841_v11, %v100_v12 }
  0x8d   :  { %v159_v15 = vadd.f32 %v156_v13, %v101_v14 }
  0x8f   :  { %1590 = vtanh.f32 %v159_v15  ;;  %v1537_v18 = vmul.f32 -1.442695, %v159_v15 }
  0x91   :  { %1592 = vpow2.f32 %v1537_v18 }
  0x92   :  { %v103_v50 = vpop.f32.mrf.mxu0 }
  0x93   :  { %v104_v51 = vadd.f32 %v1841_v11, %v103_v50 }
  0x95   :  { %v1591_v16 = vpop.eup %1590 }
  0x96   :  { %187 = vrot.lane.b32.xlu0 %v1591_v16, %s1748_s15 }
  0x97   :  { %v1593_v19 = vpop.eup %1592 }
  0x98   :  { %v163_v20 = vadd.f32 1.0, %v1593_v19 }
  0x9a   :  { %1594 = vrcp.f32 %v163_v20  ;;  %v175_v26 = vand.u32 2147483648, %v163_v20  ;;  %vm169_vm2 = vweird.f32 %v163_v20  ;;  %v173_v27 = vand.u32 2147483647, %v163_v20 }
  0x9c   :  { %v176_v29 = vor.u32 1.1754944e-38, %v175_v26  ;;  %vm174_vm4 = vcmp.eq.f32.partialorder %v173_v27, 8.507059e+37 }
  0x9e   :  { %182 = vrot.lane.b32.xlu0 %v180_v17, %s1749_s16 }
  0xa0   :  { %v1595_v21 = vpop.eup %1594 }
  0xa1   :  { %v165_v22 = vmul.f32 %v1595_v21, %v163_v20  ;;  %vm170_vm1 = vweird.f32 %v1595_v21 }
  0xa2   :  { %vm171_vm3 = vmor %vm169_vm2, %vm170_vm1 }
  0xa3   :  { %v166_v23 = vsub.f32 1.0, %v165_v22 }
  0xa5   :  { %v167_v24 = vmul.f32 %v1595_v21, %v166_v23 }
  0xa7   :  { %v168_v25 = vadd.f32 %v1595_v21, %v167_v24 }
  0xa9   :  { %v172_v28 = vsel %vm171_vm3, %v1595_v21, %v168_v25  ;;  %v50_v21 = vld [vmem:[%s2129_s0 + $0x10] sm:$0xff] }
  0xaa   :  { %v177_v31 = vsel %vm174_vm4, %v176_v29, %v172_v28  ;;  %1530 = vmatmul.msk.f32.gmra.mxu0 %vm58_vm0, %v50_v21 }
 0x108   :  { %v188_v30 = vpop.permute.xlu0 %187 }
 0x109   :  { %v190_v32 = vmul.f32 %v188_v30, %v177_v31 }
 0x10b   :  { %192 = vrot.lane.b32.xlu1 %v190_v32, %s1749_s16 }
 0x110   :  { %v183_v33 = vpop.permute.xlu0 %182 }
 0x111   :  { %v185_v34 = vmul.f32 %v183_v33, %v177_v31 }
 0x127   :  { %v106_v25 = vpop.f32.mrf.mxu0 }
 0x128   :  { %v107_v26 = vadd.f32 %v1841_v11, %v106_v25 }
 0x17d   :  { %v193_v35 = vpop.permute.xlu1 %192 }
 0x17e   :  { %v195_v36 = vadd.f32 %v193_v35, %v185_v34 }
 0x180   :  { %197 = vrot.lane.b32.xlu1 %v195_v36, %s1750_s17 }
 0x1f2   :  { %v198_v37 = vpop.permute.xlu1 %197 }
 0x1f3   :  { %200 = vst.msk [vmem:[#allocation5] sm:$0xff] %vm58_vm0, %v198_v37 }
 0x1fa   :  { %v261_v38 = vld [vmem:[#allocation5] sm:$0xff] }
 0x1fb   :  { %263 = vrot.lane.b32.xlu1 %v261_v38, %s1749_s16  ;;  %1596 = vtanh.f32 %v261_v38 }
 0x201   :  { %v1597_v39 = vpop.eup %1596 }
 0x202   :  { %204 = vrot.lane.b32.xlu2 %v1597_v39, %s1750_s17 }
 0x25c   :  { %v205_v40 = vpop.permute.xlu2 %204 }
 0x25d   :  { %v207_v41 = vmul.f32 %v205_v40, %v177_v31 }
 0x25f   :  { %209 = vrot.lane.b32.xlu2 %v207_v41, %s1749_s16 }
 0x26d   :  { %v264_v12 = vpop.permute.xlu1 %263 }
 0x2b9   :  { %v210_v47 = vpop.permute.xlu2 %209 }
 0x2ba   :  { %212 = vst.msk [vmem:[#allocation4] sm:$0xff] %vm58_vm0, %v210_v47 }
 0x2c1   :  { %v216_v48 = vld [vmem:[#allocation4] sm:$0xff] }
 0x2c2   :  { %1538 = vmatmul.msk.f32.vlgmr.msra.gmra.mxu2 %vm58_vm0, %v216_v48  ;;  %214 = vst.msk [vmem:[#allocation2] sm:$0xff] %vm58_vm0, %v216_v48 }
 0x2c3   :  { %556 = vmatpush.msra.mxu2 %v1799_v3 }
 0x2c5   :  { %557 = vmatpush.msra.mxu2 %v1802_v4 }
 0x2c7   :  { %558 = vmatpush.msra.mxu2 %v1807_v6 }
 0x2c9   :  { %v792_v49 = vld [vmem:[#allocation2] sm:$0xff]  ;;  %559 = vmatpush.msra.mxu2 %v1814_v8 }
 0x2ca   :  { %1556 = vmatmul.msk.f32.vlgmr.msra.gmra.mxu3 %vm58_vm0, %v792_v49 }
 0x345   :  { %v237_v52 = vpop.f32.mrf.mxu2 }
 0x346   :  { %v240_v53 = vadd.f32 %v237_v52, %v104_v51 }
 0x348   :  { %1598 = vtanh.f32 %v240_v53  ;;  %v1539_v55 = vmul.f32 -1.442695, %v240_v53 }
 0x34a   :  { %1600 = vpow2.f32 %v1539_v55 }
 0x34e   :  { %v1599_v54 = vpop.eup %1598 }
 0x34f   :  { %268 = vrot.lane.b32.xlu0 %v1599_v54, %s1748_s15  ;;  %v51_v54 = vld [vmem:[%s2129_s0 + $0x18] sm:$0xff] }
 0x350   :  { %v1601_v56 = vpop.eup %1600  ;;  %1531 = vmatmul.msk.f32.gmra.mxu0 %vm58_vm0, %v51_v54 }
 0x351   :  { %v244_v57 = vadd.f32 1.0, %v1601_v56 }
 0x353   :  { %1602 = vrcp.f32 %v244_v57  ;;  %v256_v63 = vand.u32 2147483648, %v244_v57  ;;  %vm250_vm6 = vweird.f32 %v244_v57  ;;  %v254_v1 = vand.u32 2147483647, %v244_v57 }
 0x355   :  { %v257_v5 = vor.u32 1.1754944e-38, %v256_v63  ;;  %vm255_vm8 = vcmp.eq.f32.partialorder %v254_v1, 8.507059e+37 }
 0x359   :  { %v1603_v58 = vpop.eup %1602 }
 0x35a   :  { %v246_v59 = vmul.f32 %v1603_v58, %v244_v57  ;;  %vm251_vm5 = vweird.f32 %v1603_v58 }
 0x35b   :  { %vm252_vm7 = vmor %vm250_vm6, %vm251_vm5 }
 0x35c   :  { %v247_v60 = vsub.f32 1.0, %v246_v59 }
 0x35e   :  { %v248_v61 = vmul.f32 %v1603_v58, %v247_v60 }
 0x360   :  { %v249_v62 = vadd.f32 %v1603_v58, %v248_v61 }
 0x362   :  { %v253_v2 = vsel %vm252_vm7, %v1603_v58, %v249_v62 }
 0x363   :  { %v258_v9 = vsel %vm255_vm8, %v257_v5, %v253_v2 }
 0x364   :  { %v266_v13 = vmul.f32 %v264_v12, %v258_v9 }
 0x3c1   :  { %v269_v7 = vpop.permute.xlu0 %268 }
 0x3c2   :  { %v271_v10 = vmul.f32 %v269_v7, %v258_v9 }
 0x3c4   :  { %273 = vrot.lane.b32.xlu2 %v271_v10, %s1749_s16 }
 0x3cd   :  { %v109_v58 = vpop.f32.mrf.mxu0 }
 0x3ce   :  { %v110_v59 = vadd.f32 %v1841_v11, %v109_v58  ;;  %v53_v58 = vld [vmem:[%s2129_s0 + $0x28] sm:$0xff] }
 0x41e   :  { %v274_v14 = vpop.permute.xlu2 %273 }
 0x41f   :  { %v276_v15 = vadd.f32 %v274_v14, %v266_v13 }
 0x421   :  { %278 = vrot.lane.b32.xlu0 %v276_v15, %s1750_s17 }
 0x493   :  { %v279_v16 = vpop.permute.xlu0 %278 }
 0x494   :  { %281 = vst.msk [vmem:[#allocation5] sm:$0xff] %vm58_vm0, %v279_v16 }
 0x49b   :  { %v282_v17 = vld [vmem:[#allocation5] sm:$0xff] }
 0x49c   :  { %1604 = vtanh.f32 %v282_v17 }
 0x4a2   :  { %v1605_v18 = vpop.eup %1604 }
 0x4a3   :  { %285 = vrot.lane.b32.xlu1 %v1605_v18, %s1750_s17 }
 0x4ab   :  { %344 = vrot.lane.b32.xlu1 %v282_v17, %s1749_s16 }
 0x515   :  { %v286_v19 = vpop.permute.xlu1 %285 }
 0x516   :  { %v288_v20 = vmul.f32 %v286_v19, %v258_v9 }
 0x518   :  { %290 = vrot.lane.b32.xlu2 %v288_v20, %s1749_s16 }
 0x51d   :  { %v345_v45 = vpop.permute.xlu1 %344 }
 0x572   :  { %v291_v22 = vpop.permute.xlu2 %290 }
 0x573   :  { %293 = vst.msk [vmem:[#allocation4] sm:$0xff] %vm58_vm0, %v291_v22 }
 0x57a   :  { %v297_v23 = vld [vmem:[#allocation4] sm:$0xff] }
 0x57b   :  { %1540 = vmatmul.msk.f32.vlgmr.msrb.gmra.mxu1 %vm58_vm0, %v297_v23  ;;  %295 = vst.msk [vmem:[#allocation2 + $0x8] sm:$0xff] %vm58_vm0, %v297_v23 }
 0x57c   :  { %637 = vmatpush.msrb.mxu1 %v1799_v3 }
 0x57e   :  { %638 = vmatpush.msrb.mxu1 %v1802_v4 }
 0x580   :  { %639 = vmatpush.msrb.mxu1 %v1807_v6 }
 0x582   :  { %v793_v24 = vld [vmem:[#allocation2 + $0x8] sm:$0xff]  ;;  %640 = vmatpush.msrb.mxu1 %v1814_v8 }
 0x583   :  { %1557 = vmatmul.msk.f32.gmra.mxu3 %vm58_vm0, %v793_v24 }
 0x5f8   :  { %v318_v27 = vpop.f32.mrf.mxu1 }
 0x5f9   :  { %v321_v28 = vadd.f32 %v318_v27, %v107_v26 }
 0x5fb   :  { %1606 = vtanh.f32 %v321_v28  ;;  %v1541_v30 = vmul.f32 -1.442695, %v321_v28 }
 0x5fd   :  { %1608 = vpow2.f32 %v1541_v30 }
 0x601   :  { %v1607_v29 = vpop.eup %1606 }
 0x602   :  { %349 = vrot.lane.b32.xlu0 %v1607_v29, %s1748_s15  ;;  %v52_v29 = vld [vmem:[%s2129_s0 + $0x20] sm:$0xff] }
 0x603   :  { %v1609_v31 = vpop.eup %1608  ;;  %1532 = vmatmul.msk.f32.gmra.mxu0 %vm58_vm0, %v52_v29 }
 0x604   :  { %v325_v32 = vadd.f32 1.0, %v1609_v31 }
 0x606   :  { %1610 = vrcp.f32 %v325_v32  ;;  %v337_v38 = vand.u32 2147483648, %v325_v32  ;;  %vm331_vm10 = vweird.f32 %v325_v32  ;;  %v335_v39 = vand.u32 2147483647, %v325_v32 }
 0x608   :  { %v338_v41 = vor.u32 1.1754944e-38, %v337_v38  ;;  %vm336_vm12 = vcmp.eq.f32.partialorder %v335_v39, 8.507059e+37 }
 0x60b   :  { %1533 = vmatmul.msk.f32.gmra.mxu0 %vm58_vm0, %v53_v58 }
 0x60c   :  { %v1611_v33 = vpop.eup %1610 }
 0x60d   :  { %v327_v34 = vmul.f32 %v1611_v33, %v325_v32  ;;  %vm332_vm9 = vweird.f32 %v1611_v33 }
 0x60e   :  { %vm333_vm11 = vmor %vm331_vm10, %vm332_vm9 }
 0x60f   :  { %v328_v35 = vsub.f32 1.0, %v327_v34 }
 0x611   :  { %v329_v36 = vmul.f32 %v1611_v33, %v328_v35 }
 0x613   :  { %v330_v37 = vadd.f32 %v1611_v33, %v329_v36 }
 0x615   :  { %v334_v40 = vsel %vm333_vm11, %v1611_v33, %v330_v37 }
 0x616   :  { %v339_v43 = vsel %vm336_vm12, %v338_v41, %v334_v40 }
 0x617   :  { %v347_v46 = vmul.f32 %v345_v45, %v339_v43 }
 0x674   :  { %v350_v42 = vpop.permute.xlu0 %349 }
 0x675   :  { %v352_v44 = vmul.f32 %v350_v42, %v339_v43 }
 0x677   :  { %354 = vrot.lane.b32.xlu2 %v352_v44, %s1749_s16 }
 0x680   :  { %v112_v33 = vpop.f32.mrf.mxu0 }
 0x681   :  { %v113_v34 = vadd.f32 %v1841_v11, %v112_v33  ;;  %v54_v33 = vld [vmem:[%s2129_s0 + $0x30] sm:$0xff] }
 0x682   :  { %1534 = vmatmul.msk.f32.gmra.mxu0 %vm58_vm0, %v54_v33 }
 0x6d1   :  { %v355_v47 = vpop.permute.xlu2 %354 }
 0x6d2   :  { %v357_v48 = vadd.f32 %v355_v47, %v347_v46 }
 0x6d4   :  { %359 = vrot.lane.b32.xlu0 %v357_v48, %s1750_s17 }
 0x746   :  { %v360_v49 = vpop.permute.xlu0 %359 }
 0x747   :  { %362 = vst.msk [vmem:[#allocation5] sm:$0xff] %vm58_vm0, %v360_v49 }
 0x74e   :  { %v363_v50 = vld [vmem:[#allocation5] sm:$0xff] }
 0x74f   :  { %1612 = vtanh.f32 %v363_v50 }
 0x755   :  { %v1613_v51 = vpop.eup %1612 }
 0x756   :  { %366 = vrot.lane.b32.xlu1 %v1613_v51, %s1750_s17 }
 0x75e   :  { %425 = vrot.lane.b32.xlu1 %v363_v50, %s1749_s16 }
 0x7c8   :  { %v367_v52 = vpop.permute.xlu1 %366 }
 0x7c9   :  { %v369_v53 = vmul.f32 %v367_v52, %v339_v43 }
 0x7cb   :  { %371 = vrot.lane.b32.xlu2 %v369_v53, %s1749_s16 }
 0x7d0   :  { %v426_v20 = vpop.permute.xlu1 %425 }
 0x825   :  { %v372_v55 = vpop.permute.xlu2 %371 }
 0x826   :  { %374 = vst.msk [vmem:[#allocation4] sm:$0xff] %vm58_vm0, %v372_v55 }
 0x82d   :  { %v378_v56 = vld [vmem:[#allocation4] sm:$0xff] }
 0x82e   :  { %1542 = vmatmul.msk.f32.vlgmr.msra.gmra.mxu1 %vm58_vm0, %v378_v56  ;;  %376 = vst.msk [vmem:[#allocation2 + $0x10] sm:$0xff] %vm58_vm0, %v378_v56 }
 0x835   :  { %v794_v57 = vld [vmem:[#allocation2 + $0x10] sm:$0xff] }
 0x836   :  { %1558 = vmatmul.msk.f32.gmra.mxu3 %vm58_vm0, %v794_v57 }
 0x8ab   :  { %v399_v60 = vpop.f32.mrf.mxu1 }
 0x8ac   :  { %v402_v61 = vadd.f32 %v399_v60, %v110_v59 }
 0x8ae   :  { %1614 = vtanh.f32 %v402_v61  ;;  %v1543_v63 = vmul.f32 -1.442695, %v402_v61 }
 0x8b0   :  { %1616 = vpow2.f32 %v1543_v63 }
 0x8b4   :  { %v1615_v62 = vpop.eup %1614 }
 0x8b5   :  { %430 = vrot.lane.b32.xlu0 %v1615_v62, %s1748_s15  ;;  %v115_v62 = vpop.f32.mrf.mxu0 }
 0x8b6   :  { %v1617_v1 = vpop.eup %1616  ;;  %v116_v63 = vadd.f32 %v1841_v11, %v115_v62  ;;  %v55_v62 = vld [vmem:[%s2129_s0 + $0x38] sm:$0xff] }
 0x8b7   :  { %v406_v2 = vadd.f32 1.0, %v1617_v1  ;;  %1535 = vmatmul.msk.f32.gmra.mxu0 %vm58_vm0, %v55_v62 }
 0x8b9   :  { %1618 = vrcp.f32 %v406_v2  ;;  %v418_v13 = vand.u32 2147483648, %v406_v2  ;;  %vm412_vm14 = vweird.f32 %v406_v2  ;;  %v416_v14 = vand.u32 2147483647, %v406_v2 }
 0x8bb   :  { %v419_v16 = vor.u32 1.1754944e-38, %v418_v13  ;;  %vm417_vm1 = vcmp.eq.f32.partialorder %v416_v14, 8.507059e+37 }
 0x8bf   :  { %v1619_v5 = vpop.eup %1618 }
 0x8c0   :  { %v408_v7 = vmul.f32 %v1619_v5, %v406_v2  ;;  %vm413_vm13 = vweird.f32 %v1619_v5 }
 0x8c1   :  { %vm414_vm15 = vmor %vm412_vm14, %vm413_vm13 }
 0x8c2   :  { %v409_v9 = vsub.f32 1.0, %v408_v7 }
 0x8c4   :  { %v410_v10 = vmul.f32 %v1619_v5, %v409_v9 }
 0x8c6   :  { %v411_v12 = vadd.f32 %v1619_v5, %v410_v10 }
 0x8c8   :  { %v415_v15 = vsel %vm414_vm15, %v1619_v5, %v411_v12 }
 0x8c9   :  { %v420_v18 = vsel %vm417_vm1, %v419_v16, %v415_v15 }
 0x8ca   :  { %v428_v21 = vmul.f32 %v426_v20, %v420_v18 }
 0x927   :  { %v431_v17 = vpop.permute.xlu0 %430 }
 0x928   :  { %v433_v19 = vmul.f32 %v431_v17, %v420_v18 }
 0x92a   :  { %435 = vrot.lane.b32.xlu2 %v433_v19, %s1749_s16 }
 0x984   :  { %v436_v22 = vpop.permute.xlu2 %435 }
 0x985   :  { %v438_v23 = vadd.f32 %v436_v22, %v428_v21 }
 0x987   :  { %440 = vrot.lane.b32.xlu0 %v438_v23, %s1750_s17 }
 0x9f9   :  { %v441_v24 = vpop.permute.xlu0 %440 }
 0x9fa   :  { %443 = vst.msk [vmem:[#allocation5] sm:$0xff] %vm58_vm0, %v441_v24 }
 0xa01   :  { %v444_v25 = vld [vmem:[#allocation5] sm:$0xff] }
 0xa02   :  { %1620 = vtanh.f32 %v444_v25 }
 0xa08   :  { %v1621_v26 = vpop.eup %1620 }
 0xa09   :  { %447 = vrot.lane.b32.xlu1 %v1621_v26, %s1750_s17 }
 0xa11   :  { %506 = vrot.lane.b32.xlu1 %v444_v25, %s1749_s16 }
 0xa7b   :  { %v448_v27 = vpop.permute.xlu1 %447 }
 0xa7c   :  { %v450_v28 = vmul.f32 %v448_v27, %v420_v18 }
 0xa7e   :  { %452 = vrot.lane.b32.xlu2 %v450_v28, %s1749_s16 }
 0xa83   :  { %v507_v49 = vpop.permute.xlu1 %506 }
 0xad8   :  { %v453_v30 = vpop.permute.xlu2 %452 }
 0xad9   :  { %455 = vst.msk [vmem:[#allocation4] sm:$0xff] %vm58_vm0, %v453_v30 }
 0xae0   :  { %v459_v31 = vld [vmem:[#allocation4] sm:$0xff] }
 0xae1   :  { %1544 = vmatmul.msk.f32.vlgmr.msrb.gmra.mxu2 %vm58_vm0, %v459_v31  ;;  %457 = vst.msk [vmem:[#allocation2 + $0x18] sm:$0xff] %vm58_vm0, %v459_v31 }
 0xae2   :  { %718 = vmatpush.msrb.mxu2 %v1799_v3 }
 0xae4   :  { %719 = vmatpush.msrb.mxu2 %v1802_v4 }
 0xae6   :  { %720 = vmatpush.msrb.mxu2 %v1807_v6 }
 0xae8   :  { %v795_v32 = vld [vmem:[#allocation2 + $0x18] sm:$0xff]  ;;  %721 = vmatpush.msrb.mxu2 %v1814_v8 }
 0xae9   :  { %1559 = vmatmul.msk.f32.gmra.mxu3 %vm58_vm0, %v795_v32 }
 0xb64   :  { %v480_v35 = vpop.f32.mrf.mxu2 }
 0xb65   :  { %v483_v36 = vadd.f32 %v480_v35, %v113_v34 }
 0xb67   :  { %1622 = vtanh.f32 %v483_v36  ;;  %v1545_v38 = vmul.f32 -1.442695, %v483_v36 }
 0xb69   :  { %1624 = vpow2.f32 %v1545_v38 }
 0xb6d   :  { %v1623_v37 = vpop.eup %1622 }
 0xb6e   :  { %511 = vrot.lane.b32.xlu0 %v1623_v37, %s1748_s15  ;;  %v118_v37 = vpop.f32.mrf.mxu0 }
 0xb6f   :  { %v1625_v3 = vpop.eup %1624  ;;  %v119_v38 = vadd.f32 %v1841_v11, %v118_v37  ;;  %v1991_v37 = vld [vmem:[#allocation7 + $0x30] sm:$0xff] }
 0xb70   :  { %v487_v4 = vadd.f32 1.0, %v1625_v3 }
 0xb72   :  { %1626 = vrcp.f32 %v487_v4  ;;  %v499_v42 = vand.u32 2147483648, %v487_v4  ;;  %vm493_vm3 = vweird.f32 %v487_v4  ;;  %v497_v43 = vand.u32 2147483647, %v487_v4 }
 0xb74   :  { %v500_v45 = vor.u32 1.1754944e-38, %v499_v42  ;;  %vm498_vm5 = vcmp.eq.f32.partialorder %v497_v43, 8.507059e+37 }
 0xb78   :  { %v1627_v6 = vpop.eup %1626 }
 0xb79   :  { %v489_v39 = vmul.f32 %v1627_v6, %v487_v4  ;;  %vm494_vm2 = vweird.f32 %v1627_v6 }
 0xb7a   :  { %vm495_vm4 = vmor %vm493_vm3, %vm494_vm2 }
 0xb7b   :  { %v490_v40 = vsub.f32 1.0, %v489_v39 }
 0xb7d   :  { %v491_v8 = vmul.f32 %v1627_v6, %v490_v40 }
 0xb7f   :  { %v492_v41 = vadd.f32 %v1627_v6, %v491_v8 }
 0xb81   :  { %v496_v44 = vsel %vm495_vm4, %v1627_v6, %v492_v41 }
 0xb82   :  { %v501_v47 = vsel %vm498_vm5, %v500_v45, %v496_v44 }
 0xb83   :  { %v509_v50 = vmul.f32 %v507_v49, %v501_v47 }
 0xbe0   :  { %v512_v46 = vpop.permute.xlu0 %511 }
 0xbe1   :  { %v514_v48 = vmul.f32 %v512_v46, %v501_v47 }
 0xbe3   :  { %516 = vrot.lane.b32.xlu2 %v514_v48, %s1749_s16 }
 0xc3d   :  { %v517_v51 = vpop.permute.xlu2 %516 }
 0xc3e   :  { %v519_v52 = vadd.f32 %v517_v51, %v509_v50 }
 0xc40   :  { %521 = vrot.lane.b32.xlu0 %v519_v52, %s1750_s17 }
 0xcb2   :  { %v522_v53 = vpop.permute.xlu0 %521 }
 0xcb3   :  { %524 = vst.msk [vmem:[#allocation5] sm:$0xff] %vm58_vm0, %v522_v53 }
 0xcba   :  { %v525_v54 = vld [vmem:[#allocation5] sm:$0xff] }
 0xcbb   :  { %1628 = vtanh.f32 %v525_v54 }
 0xcc1   :  { %v1629_v55 = vpop.eup %1628 }
 0xcc2   :  { %528 = vrot.lane.b32.xlu1 %v1629_v55, %s1750_s17 }
 0xcca   :  { %587 = vrot.lane.b32.xlu1 %v525_v54, %s1749_s16 }
 0xd34   :  { %v529_v56 = vpop.permute.xlu1 %528 }
 0xd35   :  { %v531_v57 = vmul.f32 %v529_v56, %v501_v47 }
 0xd37   :  { %533 = vrot.lane.b32.xlu2 %v531_v57, %s1749_s16 }
 0xd3c   :  { %v588_v24 = vpop.permute.xlu1 %587 }
 0xd91   :  { %v534_v59 = vpop.permute.xlu2 %533 }
 0xd92   :  { %536 = vst.msk [vmem:[#allocation4] sm:$0xff] %vm58_vm0, %v534_v59 }
 0xd99   :  { %v540_v60 = vld [vmem:[#allocation4] sm:$0xff] }
 0xd9a   :  { %1546 = vmatmul.msk.f32.vlgmr.msra.gmra.mxu2 %vm58_vm0, %v540_v60  ;;  %538 = vst.msk [vmem:[#allocation2 + $0x20] sm:$0xff] %vm58_vm0, %v540_v60 }
 0xda1   :  { %v796_v61 = vld [vmem:[#allocation2 + $0x20] sm:$0xff] }
 0xda2   :  { %1560 = vmatmul.msk.f32.gmra.mxu3 %vm58_vm0, %v796_v61 }
 0xe1d   :  { %v561_v1 = vpop.f32.mrf.mxu2 }
 0xe1e   :  { %v564_v2 = vadd.f32 %v561_v1, %v116_v63 }
 0xe20   :  { %1630 = vtanh.f32 %v564_v2  ;;  %v1547_v7 = vmul.f32 -1.442695, %v564_v2 }
 0xe22   :  { %1632 = vpow2.f32 %v1547_v7 }
 0xe26   :  { %v1631_v5 = vpop.eup %1630 }
 0xe27   :  { %592 = vrot.lane.b32.xlu0 %v1631_v5, %s1748_s15  ;;  %v121_v5 = vpop.f32.mrf.mxu0 }
 0xe28   :  { %v1633_v9 = vpop.eup %1632  ;;  %v122_v7 = vadd.f32 %v1841_v11, %v121_v5 }
 0xe29   :  { %v568_v10 = vadd.f32 1.0, %v1633_v9 }
 0xe2b   :  { %1634 = vrcp.f32 %v568_v10  ;;  %v580_v17 = vand.u32 2147483648, %v568_v10  ;;  %vm574_vm7 = vweird.f32 %v568_v10  ;;  %v578_v18 = vand.u32 2147483647, %v568_v10 }
 0xe2d   :  { %v581_v20 = vor.u32 1.1754944e-38, %v580_v17  ;;  %vm579_vm9 = vcmp.eq.f32.partialorder %v578_v18, 8.507059e+37 }
 0xe31   :  { %v1635_v12 = vpop.eup %1634 }
 0xe32   :  { %v570_v13 = vmul.f32 %v1635_v12, %v568_v10  ;;  %vm575_vm6 = vweird.f32 %v1635_v12 }
 0xe33   :  { %vm576_vm8 = vmor %vm574_vm7, %vm575_vm6 }
 0xe34   :  { %v571_v14 = vsub.f32 1.0, %v570_v13 }
 0xe36   :  { %v572_v15 = vmul.f32 %v1635_v12, %v571_v14 }
 0xe38   :  { %v573_v16 = vadd.f32 %v1635_v12, %v572_v15 }
 0xe3a   :  { %v577_v19 = vsel %vm576_vm8, %v1635_v12, %v573_v16 }
 0xe3b   :  { %v582_v22 = vsel %vm579_vm9, %v581_v20, %v577_v19 }
 0xe3c   :  { %v590_v25 = vmul.f32 %v588_v24, %v582_v22 }
 0xe99   :  { %v593_v21 = vpop.permute.xlu0 %592 }
 0xe9a   :  { %v595_v23 = vmul.f32 %v593_v21, %v582_v22 }
 0xe9c   :  { %597 = vrot.lane.b32.xlu2 %v595_v23, %s1749_s16 }
 0xef6   :  { %v598_v26 = vpop.permute.xlu2 %597 }
 0xef7   :  { %v600_v27 = vadd.f32 %v598_v26, %v590_v25 }
 0xef9   :  { %602 = vrot.lane.b32.xlu0 %v600_v27, %s1750_s17 }
 0xf6b   :  { %v603_v28 = vpop.permute.xlu0 %602 }
 0xf6c   :  { %605 = vst.msk [vmem:[#allocation5] sm:$0xff] %vm58_vm0, %v603_v28 }
 0xf73   :  { %v606_v29 = vld [vmem:[#allocation5] sm:$0xff] }
 0xf74   :  { %1636 = vtanh.f32 %v606_v29 }
 0xf7a   :  { %v1637_v30 = vpop.eup %1636 }
 0xf7b   :  { %609 = vrot.lane.b32.xlu1 %v1637_v30, %s1750_s17 }
 0xf83   :  { %668 = vrot.lane.b32.xlu1 %v606_v29, %s1749_s16 }
 0xfed   :  { %v610_v31 = vpop.permute.xlu1 %609 }
 0xfee   :  { %v612_v32 = vmul.f32 %v610_v31, %v582_v22 }
 0xff0   :  { %614 = vrot.lane.b32.xlu2 %v612_v32, %s1749_s16 }
 0xff5   :  { %v669_v53 = vpop.permute.xlu1 %668 }
0x104a   :  { %v615_v34 = vpop.permute.xlu2 %614 }
0x104b   :  { %617 = vst.msk [vmem:[#allocation4] sm:$0xff] %vm58_vm0, %v615_v34 }
0x1052   :  { %v621_v35 = vld [vmem:[#allocation4] sm:$0xff] }
0x1053   :  { %1548 = vmatmul.msk.f32.vlgmr.msrb.gmra.mxu1 %vm58_vm0, %v621_v35  ;;  %619 = vst.msk [vmem:[#allocation2 + $0x28] sm:$0xff] %vm58_vm0, %v621_v35 }
0x105a   :  { %v797_v36 = vld [vmem:[#allocation2 + $0x28] sm:$0xff] }
0x105b   :  { %1561 = vmatmul.msk.f32.gmra.mxu3 %vm58_vm0, %v797_v36  ;;  %v1989_v36 = vld [vmem:[#allocation7 + $0x38] sm:$0xff] }
0x105c   :  { %894 = vmatpush.msra.mxu1 %v1989_v36  ;;  %973 = vmatpush.msra.mxu2 %v1989_v36 }
0x105e   :  { %895 = vmatpush.msra.mxu1 %v1991_v37  ;;  %974 = vmatpush.msra.mxu2 %v1991_v37 }
0x10d0   :  { %v642_v3 = vpop.f32.mrf.mxu1 }
0x10d1   :  { %v645_v4 = vadd.f32 %v642_v3, %v119_v38  ;;  %v1995_v38 = vld [vmem:[#allocation7 + $0x28] sm:$0xff]  ;;  %v1999_v3 = vld [vmem:[#allocation7 + $0x20] sm:$0xff] }
0x10d2   :  { %896 = vmatpush.msra.mxu1 %v1995_v38  ;;  %975 = vmatpush.msra.mxu2 %v1995_v38 }
0x10d3   :  { %1638 = vtanh.f32 %v645_v4  ;;  %v1549_v39 = vmul.f32 -1.442695, %v645_v4 }
0x10d4   :  { %897 = vmatpush.msra.mxu1 %v1999_v3  ;;  %976 = vmatpush.msra.mxu2 %v1999_v3 }
0x10d5   :  { %1640 = vpow2.f32 %v1549_v39 }
0x10d6   :  { %1052 = vmatpush.msrb.mxu1 %v1989_v36 }
0x10d8   :  { %1053 = vmatpush.msrb.mxu1 %v1991_v37 }
0x10d9   :  { %v1639_v6 = vpop.eup %1638 }
0x10da   :  { %673 = vrot.lane.b32.xlu0 %v1639_v6, %s1748_s15  ;;  %1054 = vmatpush.msrb.mxu1 %v1995_v38 }
0x10db   :  { %v1641_v40 = vpop.eup %1640 }
0x10dc   :  { %v649_v8 = vadd.f32 1.0, %v1641_v40  ;;  %1055 = vmatpush.msrb.mxu1 %v1999_v3 }
0x10de   :  { %1642 = vrcp.f32 %v649_v8  ;;  %v661_v46 = vand.u32 2147483648, %v649_v8  ;;  %vm655_vm11 = vweird.f32 %v649_v8  ;;  %v659_v47 = vand.u32 2147483647, %v649_v8 }
0x10e0   :  { %v662_v49 = vor.u32 1.1754944e-38, %v661_v46  ;;  %vm660_vm13 = vcmp.eq.f32.partialorder %v659_v47, 8.507059e+37 }
0x10e4   :  { %v1643_v41 = vpop.eup %1642 }
0x10e5   :  { %v651_v42 = vmul.f32 %v1643_v41, %v649_v8  ;;  %vm656_vm10 = vweird.f32 %v1643_v41 }
0x10e6   :  { %vm657_vm12 = vmor %vm655_vm11, %vm656_vm10 }
0x10e7   :  { %v652_v43 = vsub.f32 1.0, %v651_v42 }
0x10e9   :  { %v653_v44 = vmul.f32 %v1643_v41, %v652_v43 }
0x10eb   :  { %v654_v45 = vadd.f32 %v1643_v41, %v653_v44 }
0x10ed   :  { %v658_v48 = vsel %vm657_vm12, %v1643_v41, %v654_v45  ;;  %v2027_v41 = vld [vmem:[%s2132_s3 + $0x1] ss:$0 sm:$0xff] }
0x10ee   :  { %v663_v51 = vsel %vm660_vm13, %v662_v49, %v658_v48 }
0x10ef   :  { %v671_v54 = vmul.f32 %v669_v53, %v663_v51 }
0x114c   :  { %v674_v50 = vpop.permute.xlu0 %673 }
0x114d   :  { %v676_v52 = vmul.f32 %v674_v50, %v663_v51 }
0x114f   :  { %678 = vrot.lane.b32.xlu2 %v676_v52, %s1749_s16 }
0x11a9   :  { %v679_v55 = vpop.permute.xlu2 %678 }
0x11aa   :  { %v681_v56 = vadd.f32 %v679_v55, %v671_v54 }
0x11ac   :  { %683 = vrot.lane.b32.xlu0 %v681_v56, %s1750_s17 }
0x121e   :  { %v684_v57 = vpop.permute.xlu0 %683 }
0x121f   :  { %686 = vst.msk [vmem:[#allocation5] sm:$0xff] %vm58_vm0, %v684_v57 }
0x1226   :  { %v687_v58 = vld [vmem:[#allocation5] sm:$0xff] }
0x1227   :  { %1644 = vtanh.f32 %v687_v58 }
0x122d   :  { %v1645_v59 = vpop.eup %1644 }
0x122e   :  { %690 = vrot.lane.b32.xlu1 %v1645_v59, %s1750_s17 }
0x1236   :  { %749 = vrot.lane.b32.xlu1 %v687_v58, %s1749_s16 }
0x12a0   :  { %v691_v60 = vpop.permute.xlu1 %690 }
0x12a1   :  { %v693_v61 = vmul.f32 %v691_v60, %v663_v51 }
0x12a3   :  { %695 = vrot.lane.b32.xlu2 %v693_v61, %s1749_s16 }
0x12a8   :  { %v750_v27 = vpop.permute.xlu1 %749 }
0x12fd   :  { %v696_v63 = vpop.permute.xlu2 %695 }
0x12fe   :  { %698 = vst.msk [vmem:[#allocation4] sm:$0xff] %vm58_vm0, %v696_v63 }
0x1305   :  { %v702_v1 = vld [vmem:[#allocation4] sm:$0xff] }
0x1306   :  { %1550 = vmatmul.msk.f32.vlgmr.msrb.gmra.mxu2 %vm58_vm0, %v702_v1  ;;  %700 = vst.msk [vmem:[#allocation2 + $0x30] sm:$0xff] %vm58_vm0, %v702_v1 }
0x1307   :  { %1131 = vmatpush.msrb.mxu2 %v1989_v36 }
0x1309   :  { %1132 = vmatpush.msrb.mxu2 %v1991_v37 }
0x130b   :  { %1133 = vmatpush.msrb.mxu2 %v1995_v38 }
0x130d   :  { %v798_v2 = vld [vmem:[#allocation2 + $0x30] sm:$0xff]  ;;  %1134 = vmatpush.msrb.mxu2 %v1999_v3 }
0x130e   :  { %1562 = vmatmul.msk.f32.gmra.mxu3 %vm58_vm0, %v798_v2 }
0x1389   :  { %v723_v9 = vpop.f32.mrf.mxu2 }
0x138a   :  { %v726_v10 = vadd.f32 %v723_v9, %v122_v7 }
0x138c   :  { %1646 = vtanh.f32 %v726_v10  ;;  %v1551_v13 = vmul.f32 -1.442695, %v726_v10 }
0x138e   :  { %1648 = vpow2.f32 %v1551_v13 }
0x1392   :  { %v1647_v12 = vpop.eup %1646 }
0x1393   :  { %754 = vrot.lane.b32.xlu0 %v1647_v12, %s1748_s15 }
0x1394   :  { %v1649_v14 = vpop.eup %1648 }
0x1395   :  { %v730_v15 = vadd.f32 1.0, %v1649_v14 }
0x1397   :  { %1650 = vrcp.f32 %v730_v15  ;;  %v742_v21 = vand.u32 2147483648, %v730_v15  ;;  %vm736_vm15 = vweird.f32 %v730_v15  ;;  %v740_v11 = vand.u32 2147483647, %v730_v15 }
0x1399   :  { %v743_v23 = vor.u32 1.1754944e-38, %v742_v21  ;;  %vm741_vm2 = vcmp.eq.f32.partialorder %v740_v11, 8.507059e+37 }
0x139d   :  { %v1651_v16 = vpop.eup %1650 }
0x139e   :  { %v732_v17 = vmul.f32 %v1651_v16, %v730_v15  ;;  %vm737_vm14 = vweird.f32 %v1651_v16 }
0x139f   :  { %vm738_vm1 = vmor %vm736_vm15, %vm737_vm14 }
0x13a0   :  { %v733_v18 = vsub.f32 1.0, %v732_v17 }
0x13a2   :  { %v734_v19 = vmul.f32 %v1651_v16, %v733_v18 }
0x13a4   :  { %v735_v20 = vadd.f32 %v1651_v16, %v734_v19 }
0x13a6   :  { %v739_v22 = vsel %vm738_vm1, %v1651_v16, %v735_v20 }
0x13a7   :  { %v744_v25 = vsel %vm741_vm2, %v743_v23, %v739_v22 }
0x13a8   :  { %v752_v28 = vmul.f32 %v750_v27, %v744_v25 }
0x1405   :  { %v755_v24 = vpop.permute.xlu0 %754 }
0x1406   :  { %v757_v26 = vmul.f32 %v755_v24, %v744_v25 }
0x1408   :  { %759 = vrot.lane.b32.xlu2 %v757_v26, %s1749_s16 }
0x1462   :  { %v760_v29 = vpop.permute.xlu2 %759 }
0x1463   :  { %v762_v30 = vadd.f32 %v760_v29, %v752_v28 }
0x1465   :  { %764 = vrot.lane.b32.xlu0 %v762_v30, %s1750_s17 }
0x14d7   :  { %v765_v31 = vpop.permute.xlu0 %764 }
0x14d8   :  { %767 = vst.msk [vmem:[#allocation5] sm:$0xff] %vm58_vm0, %v765_v31 }
0x14df   :  { %v768_v32 = vld [vmem:[#allocation5] sm:$0xff] }
0x14e0   :  { %876 = vst.msk [vmem:[#allocation5] sm:$0xff] %vm58_vm0, %v1747_v0  ;;  %1652 = vtanh.f32 %v768_v32 }
0x14e6   :  { %v1653_v33 = vpop.eup %1652 }
0x14e7   :  { %771 = vrot.lane.b32.xlu1 %v1653_v33, %s1750_s17  ;;  %v923_v4 = vld [vmem:[#allocation5] sm:$0xff] }
0x14ef   :  { %925 = vrot.lane.b32.xlu1 %v923_v4, %s1749_s16 }
0x1559   :  { %v772_v34 = vpop.permute.xlu1 %771 }
0x155a   :  { %v774_v35 = vmul.f32 %v772_v34, %v744_v25 }
0x155c   :  { %776 = vrot.lane.b32.xlu2 %v774_v35, %s1749_s16 }
0x1561   :  { %v926_v61 = vpop.permute.xlu1 %925 }
0x15b6   :  { %v777_v6 = vpop.permute.xlu2 %776 }
0x15b7   :  { %779 = vst.msk [vmem:[#allocation4] sm:$0xff] %vm58_vm0, %v777_v6 }
0x15be   :  { %v780_v39 = vld [vmem:[#allocation4] sm:$0xff] }
0x15bf   :  { %781 = vst.msk [vmem:[#allocation2 + $0x38] sm:$0xff] %vm58_vm0, %v780_v39 }
0x15c0   :  { %875 = vst.msk [vmem:[#allocation4] sm:$0xff] %vm58_vm0, %v1747_v0  ;;  %v843_v0 = vpop.f32.mrf.mxu3 }
0x15c1   :  { %v844_v42 = vadd.f32 %v2027_v41, %v843_v0 }
0x15c6   :  { %v799_v40 = vld [vmem:[#allocation2 + $0x38] sm:$0xff] }
0x15c7   :  { %1563 = vmatmul.msk.f32.gmra.mxu3 %vm58_vm0, %v799_v40  ;;  %v878_v8 = vld [vmem:[#allocation4] sm:$0xff] }
0x15c8   :  { %1564 = vmatmul.msk.f32.vlgmr.msra.gmra.mxu1 %vm58_vm0, %v878_v8  ;;  %v846_v14 = vpop.f32.mrf.mxu3 }
0x15c9   :  { %1210 = vmatpush.msra.mxu1 %v1989_v36  ;;  %v847_v15 = vadd.f32 %v2027_v41, %v846_v14 }
0x15cb   :  { %1211 = vmatpush.msra.mxu1 %v1991_v37 }
0x15cd   :  { %1212 = vmatpush.msra.mxu1 %v1995_v38 }
0x15cf   :  { %1213 = vmatpush.msra.mxu1 %v1999_v3 }
0x1645   :  { %v899_v43 = vpop.f32.mrf.mxu1 }
0x1646   :  { %v902_v44 = vadd.f32 %v899_v43, %v844_v42 }
0x1648   :  { %1654 = vtanh.f32 %v902_v44  ;;  %v1565_v46 = vmul.f32 -1.442695, %v902_v44  ;;  %v849_v44 = vpop.f32.mrf.mxu3 }
0x164a   :  { %1656 = vpow2.f32 %v1565_v46 }
0x164e   :  { %v1655_v45 = vpop.eup %1654 }
0x164f   :  { %930 = vrot.lane.b32.xlu0 %v1655_v45, %s1748_s15  ;;  %v850_v45 = vadd.f32 %v2027_v41, %v849_v44 }
0x1650   :  { %v1657_v47 = vpop.eup %1656 }
0x1651   :  { %v906_v48 = vadd.f32 1.0, %v1657_v47 }
0x1653   :  { %1658 = vrcp.f32 %v906_v48  ;;  %v918_v54 = vand.u32 2147483648, %v906_v48  ;;  %vm912_vm4 = vweird.f32 %v906_v48  ;;  %v916_v55 = vand.u32 2147483647, %v906_v48 }
0x1655   :  { %v919_v57 = vor.u32 1.1754944e-38, %v918_v54  ;;  %vm917_vm6 = vcmp.eq.f32.partialorder %v916_v55, 8.507059e+37 }
0x1659   :  { %v1659_v49 = vpop.eup %1658 }
0x165a   :  { %v908_v50 = vmul.f32 %v1659_v49, %v906_v48  ;;  %vm913_vm3 = vweird.f32 %v1659_v49 }
0x165b   :  { %vm914_vm5 = vmor %vm912_vm4, %vm913_vm3 }
0x165c   :  { %v909_v51 = vsub.f32 1.0, %v908_v50 }
0x165e   :  { %v910_v52 = vmul.f32 %v1659_v49, %v909_v51 }
0x1660   :  { %v911_v53 = vadd.f32 %v1659_v49, %v910_v52 }
0x1662   :  { %v915_v56 = vsel %vm914_vm5, %v1659_v49, %v911_v53 }
0x1663   :  { %v920_v58 = vsel %vm917_vm6, %v919_v57, %v915_v56 }
0x1664   :  { %v928_v62 = vmul.f32 %v926_v61, %v920_v58 }
0x16c1   :  { %v931_v59 = vpop.permute.xlu0 %930 }
0x16c2   :  { %v933_v60 = vmul.f32 %v931_v59, %v920_v58 }
0x16c4   :  { %935 = vrot.lane.b32.xlu2 %v933_v60, %s1749_s16 }
0x171e   :  { %v936_v63 = vpop.permute.xlu2 %935 }
0x171f   :  { %v938_v1 = vadd.f32 %v936_v63, %v928_v62 }
0x1721   :  { %940 = vrot.lane.b32.xlu0 %v938_v1, %s1750_s17 }
0x1793   :  { %v941_v2 = vpop.permute.xlu0 %940 }
0x1794   :  { %943 = vst.msk [vmem:[#allocation5] sm:$0xff] %vm58_vm0, %v941_v2 }
0x179b   :  { %v944_v5 = vld [vmem:[#allocation5] sm:$0xff] }
0x179c   :  { %1660 = vtanh.f32 %v944_v5 }
0x17a2   :  { %v1661_v7 = vpop.eup %1660 }
0x17a3   :  { %947 = vrot.lane.b32.xlu1 %v1661_v7, %s1750_s17 }
0x17ab   :  { %1004 = vrot.lane.b32.xlu1 %v944_v5, %s1749_s16 }
0x1815   :  { %v948_v9 = vpop.permute.xlu1 %947 }
0x1816   :  { %v950_v10 = vmul.f32 %v948_v9, %v920_v58 }
0x1818   :  { %952 = vrot.lane.b32.xlu2 %v950_v10, %s1749_s16 }
0x181d   :  { %v1005_v33 = vpop.permute.xlu1 %1004 }
0x1872   :  { %v953_v12 = vpop.permute.xlu2 %952 }
0x1873   :  { %955 = vst.msk [vmem:[#allocation4] sm:$0xff] %vm58_vm0, %v953_v12 }
0x187a   :  { %v957_v13 = vld [vmem:[#allocation4] sm:$0xff] }
0x187b   :  { %1566 = vmatmul.msk.f32.vlgmr.msra.gmra.mxu2 %vm58_vm0, %v957_v13 }
0x187c   :  { %1289 = vmatpush.msra.mxu2 %v1989_v36 }
0x187e   :  { %1290 = vmatpush.msra.mxu2 %v1991_v37 }
0x1880   :  { %1291 = vmatpush.msra.mxu2 %v1995_v38 }
0x1882   :  { %1292 = vmatpush.msra.mxu2 %v1999_v3 }
0x18fe   :  { %v978_v16 = vpop.f32.mrf.mxu2 }
0x18ff   :  { %v981_v17 = vadd.f32 %v978_v16, %v847_v15 }
0x1901   :  { %1662 = vtanh.f32 %v981_v17  ;;  %v1567_v19 = vmul.f32 -1.442695, %v981_v17  ;;  %v852_v17 = vpop.f32.mrf.mxu3 }
0x1903   :  { %1664 = vpow2.f32 %v1567_v19 }
0x1907   :  { %v1663_v18 = vpop.eup %1662 }
0x1908   :  { %1009 = vrot.lane.b32.xlu0 %v1663_v18, %s1748_s15  ;;  %v853_v18 = vadd.f32 %v2027_v41, %v852_v17 }
0x1909   :  { %v1665_v20 = vpop.eup %1664 }
0x190a   :  { %v985_v21 = vadd.f32 1.0, %v1665_v20 }
0x190c   :  { %1666 = vrcp.f32 %v985_v21  ;;  %v997_v26 = vand.u32 2147483648, %v985_v21  ;;  %vm991_vm8 = vweird.f32 %v985_v21  ;;  %v995_v27 = vand.u32 2147483647, %v985_v21 }
0x190e   :  { %v998_v29 = vor.u32 1.1754944e-38, %v997_v26  ;;  %vm996_vm10 = vcmp.eq.f32.partialorder %v995_v27, 8.507059e+37 }
0x1912   :  { %v1667_v11 = vpop.eup %1666 }
0x1913   :  { %v987_v22 = vmul.f32 %v1667_v11, %v985_v21  ;;  %vm992_vm7 = vweird.f32 %v1667_v11 }
0x1914   :  { %vm993_vm9 = vmor %vm991_vm8, %vm992_vm7 }
0x1915   :  { %v988_v23 = vsub.f32 1.0, %v987_v22 }
0x1917   :  { %v989_v24 = vmul.f32 %v1667_v11, %v988_v23 }
0x1919   :  { %v990_v25 = vadd.f32 %v1667_v11, %v989_v24 }
0x191b   :  { %v994_v28 = vsel %vm993_vm9, %v1667_v11, %v990_v25 }
0x191c   :  { %v999_v31 = vsel %vm996_vm10, %v998_v29, %v994_v28 }
0x191d   :  { %v1007_v34 = vmul.f32 %v1005_v33, %v999_v31 }
0x197a   :  { %v1010_v30 = vpop.permute.xlu0 %1009 }
0x197b   :  { %v1012_v32 = vmul.f32 %v1010_v30, %v999_v31 }
0x197d   :  { %1014 = vrot.lane.b32.xlu2 %v1012_v32, %s1749_s16 }
0x19d7   :  { %v1015_v35 = vpop.permute.xlu2 %1014 }
0x19d8   :  { %v1017_v4 = vadd.f32 %v1015_v35, %v1007_v34 }
0x19da   :  { %1019 = vrot.lane.b32.xlu0 %v1017_v4, %s1750_s17 }
0x1a4c   :  { %v1020_v6 = vpop.permute.xlu0 %1019 }
0x1a4d   :  { %1022 = vst.msk [vmem:[#allocation5] sm:$0xff] %vm58_vm0, %v1020_v6 }
0x1a54   :  { %v1023_v39 = vld [vmem:[#allocation5] sm:$0xff] }
0x1a55   :  { %1668 = vtanh.f32 %v1023_v39 }
0x1a5b   :  { %v1669_v40 = vpop.eup %1668 }
0x1a5c   :  { %1026 = vrot.lane.b32.xlu1 %v1669_v40, %s1750_s17 }
0x1a64   :  { %1083 = vrot.lane.b32.xlu1 %v1023_v39, %s1749_s16 }
0x1ace   :  { %v1027_v8 = vpop.permute.xlu1 %1026 }
0x1acf   :  { %v1029_v0 = vmul.f32 %v1027_v8, %v999_v31 }
0x1ad1   :  { %1031 = vrot.lane.b32.xlu2 %v1029_v0, %s1749_s16 }
0x1ad6   :  { %v1084_v1 = vpop.permute.xlu1 %1083 }
0x1b2b   :  { %v1032_v42 = vpop.permute.xlu2 %1031 }
0x1b2c   :  { %1034 = vst.msk [vmem:[#allocation4] sm:$0xff] %vm58_vm0, %v1032_v42 }
0x1b33   :  { %v1036_v43 = vld [vmem:[#allocation4] sm:$0xff] }
0x1b34   :  { %1568 = vmatmul.msk.f32.vlgmr.msrb.gmra.mxu1 %vm58_vm0, %v1036_v43  ;;  %v855_v43 = vpop.f32.mrf.mxu3 }
0x1b35   :  { %1368 = vmatpush.msrb.mxu1 %v1989_v36  ;;  %v856_v44 = vadd.f32 %v2027_v41, %v855_v43 }
0x1b37   :  { %1369 = vmatpush.msrb.mxu1 %v1991_v37 }
0x1b39   :  { %1370 = vmatpush.msrb.mxu1 %v1995_v38 }
0x1b3b   :  { %1371 = vmatpush.msrb.mxu1 %v1999_v3 }
0x1bb1   :  { %v1057_v46 = vpop.f32.mrf.mxu1 }
0x1bb2   :  { %v1060_v47 = vadd.f32 %v1057_v46, %v850_v45 }
0x1bb4   :  { %1670 = vtanh.f32 %v1060_v47  ;;  %v1569_v49 = vmul.f32 -1.442695, %v1060_v47 }
0x1bb6   :  { %1672 = vpow2.f32 %v1569_v49 }
0x1bba   :  { %v1671_v48 = vpop.eup %1670 }
0x1bbb   :  { %1088 = vrot.lane.b32.xlu0 %v1671_v48, %s1748_s15 }
0x1bbc   :  { %v1673_v50 = vpop.eup %1672 }
0x1bbd   :  { %v1064_v51 = vadd.f32 1.0, %v1673_v50 }
0x1bbf   :  { %1674 = vrcp.f32 %v1064_v51  ;;  %v1076_v57 = vand.u32 2147483648, %v1064_v51  ;;  %vm1070_vm12 = vweird.f32 %v1064_v51  ;;  %v1074_v58 = vand.u32 2147483647, %v1064_v51 }
0x1bc1   :  { %v1077_v60 = vor.u32 1.1754944e-38, %v1076_v57  ;;  %vm1075_vm14 = vcmp.eq.f32.partialorder %v1074_v58, 8.507059e+37 }
0x1bc5   :  { %v1675_v52 = vpop.eup %1674 }
0x1bc6   :  { %v1066_v53 = vmul.f32 %v1675_v52, %v1064_v51  ;;  %vm1071_vm11 = vweird.f32 %v1675_v52 }
0x1bc7   :  { %vm1072_vm13 = vmor %vm1070_vm12, %vm1071_vm11 }
0x1bc8   :  { %v1067_v54 = vsub.f32 1.0, %v1066_v53 }
0x1bca   :  { %v1068_v55 = vmul.f32 %v1675_v52, %v1067_v54 }
0x1bcc   :  { %v1069_v56 = vadd.f32 %v1675_v52, %v1068_v55 }
0x1bce   :  { %v1073_v59 = vsel %vm1072_vm13, %v1675_v52, %v1069_v56 }
0x1bcf   :  { %v1078_v62 = vsel %vm1075_vm14, %v1077_v60, %v1073_v59 }
0x1bd0   :  { %v1086_v2 = vmul.f32 %v1084_v1, %v1078_v62 }
0x1c2d   :  { %v1089_v61 = vpop.permute.xlu0 %1088 }
0x1c2e   :  { %v1091_v63 = vmul.f32 %v1089_v61, %v1078_v62 }
0x1c30   :  { %1093 = vrot.lane.b32.xlu2 %v1091_v63, %s1749_s16 }
0x1c8a   :  { %v1094_v5 = vpop.permute.xlu2 %1093 }
0x1c8b   :  { %v1096_v7 = vadd.f32 %v1094_v5, %v1086_v2 }
0x1c8d   :  { %1098 = vrot.lane.b32.xlu0 %v1096_v7, %s1750_s17 }
0x1cff   :  { %v1099_v9 = vpop.permute.xlu0 %1098 }
0x1d00   :  { %1101 = vst.msk [vmem:[#allocation5] sm:$0xff] %vm58_vm0, %v1099_v9 }
0x1d07   :  { %v1102_v10 = vld [vmem:[#allocation5] sm:$0xff] }
0x1d08   :  { %1676 = vtanh.f32 %v1102_v10 }
0x1d0e   :  { %v1677_v12 = vpop.eup %1676 }
0x1d0f   :  { %1105 = vrot.lane.b32.xlu1 %v1677_v12, %s1750_s17 }
0x1d17   :  { %1162 = vrot.lane.b32.xlu1 %v1102_v10, %s1749_s16 }
0x1d81   :  { %v1106_v13 = vpop.permute.xlu1 %1105 }
0x1d82   :  { %v1108_v14 = vmul.f32 %v1106_v13, %v1078_v62 }
0x1d84   :  { %1110 = vrot.lane.b32.xlu2 %v1108_v14, %s1749_s16 }
0x1d89   :  { %v1163_v32 = vpop.permute.xlu1 %1162 }
0x1dde   :  { %v1111_v15 = vpop.permute.xlu2 %1110 }
0x1ddf   :  { %1113 = vst.msk [vmem:[#allocation4] sm:$0xff] %vm58_vm0, %v1111_v15 }
0x1de6   :  { %v1115_v16 = vld [vmem:[#allocation4] sm:$0xff] }
0x1de7   :  { %1570 = vmatmul.msk.f32.vlgmr.msrb.gmra.mxu2 %vm58_vm0, %v1115_v16  ;;  %v858_v16 = vpop.f32.mrf.mxu3 }
0x1de8   :  { %1447 = vmatpush.msrb.mxu2 %v1989_v36  ;;  %v859_v17 = vadd.f32 %v2027_v41, %v858_v16 }
0x1dea   :  { %1448 = vmatpush.msrb.mxu2 %v1991_v37 }
0x1dec   :  { %1449 = vmatpush.msrb.mxu2 %v1995_v38 }
0x1dee   :  { %1450 = vmatpush.msrb.mxu2 %v1999_v3 }
0x1e6a   :  { %v1136_v19 = vpop.f32.mrf.mxu2 }
0x1e6b   :  { %v1139_v20 = vadd.f32 %v1136_v19, %v853_v18 }
0x1e6d   :  { %1678 = vtanh.f32 %v1139_v20  ;;  %v1571_v11 = vmul.f32 -1.442695, %v1139_v20 }
0x1e6f   :  { %1680 = vpow2.f32 %v1571_v11 }
0x1e73   :  { %v1679_v21 = vpop.eup %1678 }
0x1e74   :  { %1167 = vrot.lane.b32.xlu0 %v1679_v21, %s1748_s15 }
0x1e75   :  { %v1681_v22 = vpop.eup %1680 }
0x1e76   :  { %v1143_v23 = vadd.f32 1.0, %v1681_v22 }
0x1e78   :  { %1682 = vrcp.f32 %v1143_v23  ;;  %v1155_v3 = vand.u32 2147483648, %v1143_v23  ;;  %vm1149_vm1 = vweird.f32 %v1143_v23  ;;  %v1153_v26 = vand.u32 2147483647, %v1143_v23 }
0x1e7a   :  { %v1156_v28 = vor.u32 1.1754944e-38, %v1155_v3  ;;  %vm1154_vm3 = vcmp.eq.f32.partialorder %v1153_v26, 8.507059e+37 }
0x1e7e   :  { %v1683_v36 = vpop.eup %1682 }
0x1e7f   :  { %v1145_v37 = vmul.f32 %v1683_v36, %v1143_v23  ;;  %vm1150_vm15 = vweird.f32 %v1683_v36 }
0x1e80   :  { %vm1151_vm2 = vmor %vm1149_vm1, %vm1150_vm15 }
0x1e81   :  { %v1146_v24 = vsub.f32 1.0, %v1145_v37 }
0x1e83   :  { %v1147_v38 = vmul.f32 %v1683_v36, %v1146_v24 }
0x1e85   :  { %v1148_v25 = vadd.f32 %v1683_v36, %v1147_v38 }
0x1e87   :  { %v1152_v27 = vsel %vm1151_vm2, %v1683_v36, %v1148_v25 }
0x1e88   :  { %v1157_v30 = vsel %vm1154_vm3, %v1156_v28, %v1152_v27 }
0x1e89   :  { %v1165_v33 = vmul.f32 %v1163_v32, %v1157_v30 }
0x1ee6   :  { %v1168_v29 = vpop.permute.xlu0 %1167 }
0x1ee7   :  { %v1170_v31 = vmul.f32 %v1168_v29, %v1157_v30 }
0x1ee9   :  { %1172 = vrot.lane.b32.xlu2 %v1170_v31, %s1749_s16 }
0x1f43   :  { %v1173_v34 = vpop.permute.xlu2 %1172 }
0x1f44   :  { %v1175_v35 = vadd.f32 %v1173_v34, %v1165_v33 }
0x1f46   :  { %1177 = vrot.lane.b32.xlu0 %v1175_v35, %s1750_s17 }
0x1fb8   :  { %v1178_v4 = vpop.permute.xlu0 %1177 }
0x1fb9   :  { %1180 = vst.msk [vmem:[#allocation5] sm:$0xff] %vm58_vm0, %v1178_v4 }
0x1fc0   :  { %v1181_v6 = vld [vmem:[#allocation5] sm:$0xff] }
0x1fc1   :  { %1684 = vtanh.f32 %v1181_v6 }
0x1fc7   :  { %v1685_v39 = vpop.eup %1684 }
0x1fc8   :  { %1184 = vrot.lane.b32.xlu1 %v1685_v39, %s1750_s17 }
0x1fd0   :  { %1241 = vrot.lane.b32.xlu1 %v1181_v6, %s1749_s16 }
0x203a   :  { %v1185_v40 = vpop.permute.xlu1 %1184 }
0x203b   :  { %v1187_v8 = vmul.f32 %v1185_v40, %v1157_v30 }
0x203d   :  { %1189 = vrot.lane.b32.xlu2 %v1187_v8, %s1749_s16 }
0x2042   :  { %v1242_v63 = vpop.permute.xlu1 %1241 }
0x2097   :  { %v1190_v0 = vpop.permute.xlu2 %1189 }
0x2098   :  { %1192 = vst.msk [vmem:[#allocation4] sm:$0xff] %vm58_vm0, %v1190_v0 }
0x209f   :  { %v1194_v42 = vld [vmem:[#allocation4] sm:$0xff] }
0x20a0   :  { %1572 = vmatmul.msk.f32.vlgmr.msra.gmra.mxu1 %vm58_vm0, %v1194_v42  ;;  %v861_v42 = vpop.f32.mrf.mxu3 }
0x20a1   :  { %v862_v43 = vadd.f32 %v2027_v41, %v861_v42 }
0x211d   :  { %v1215_v45 = vpop.f32.mrf.mxu1 }
0x211e   :  { %v1218_v46 = vadd.f32 %v1215_v45, %v856_v44 }
0x2120   :  { %1686 = vtanh.f32 %v1218_v46  ;;  %v1573_v48 = vmul.f32 -1.442695, %v1218_v46 }
0x2122   :  { %1688 = vpow2.f32 %v1573_v48 }
0x2126   :  { %v1687_v47 = vpop.eup %1686 }
0x2127   :  { %1246 = vrot.lane.b32.xlu0 %v1687_v47, %s1748_s15 }
0x2128   :  { %v1689_v49 = vpop.eup %1688 }
0x2129   :  { %v1222_v50 = vadd.f32 1.0, %v1689_v49 }
0x212b   :  { %1690 = vrcp.f32 %v1222_v50  ;;  %v1234_v56 = vand.u32 2147483648, %v1222_v50  ;;  %vm1228_vm5 = vweird.f32 %v1222_v50  ;;  %v1232_v57 = vand.u32 2147483647, %v1222_v50 }
0x212d   :  { %v1235_v59 = vor.u32 1.1754944e-38, %v1234_v56  ;;  %vm1233_vm7 = vcmp.eq.f32.partialorder %v1232_v57, 8.507059e+37 }
0x2131   :  { %v1691_v51 = vpop.eup %1690 }
0x2132   :  { %v1224_v52 = vmul.f32 %v1691_v51, %v1222_v50  ;;  %vm1229_vm4 = vweird.f32 %v1691_v51 }
0x2133   :  { %vm1230_vm6 = vmor %vm1228_vm5, %vm1229_vm4  ;;  %vm1521_vm5 = vcmask 7168  }
0x2134   :  { %v1225_v53 = vsub.f32 1.0, %v1224_v52 }
0x2136   :  { %v1226_v54 = vmul.f32 %v1691_v51, %v1225_v53 }
0x2138   :  { %v1227_v55 = vadd.f32 %v1691_v51, %v1226_v54 }
0x213a   :  { %v1231_v58 = vsel %vm1230_vm6, %v1691_v51, %v1227_v55 }
0x213b   :  { %v1236_v61 = vsel %vm1233_vm7, %v1235_v59, %v1231_v58 }
0x213c   :  { %v1244_v1 = vmul.f32 %v1242_v63, %v1236_v61 }
0x2199   :  { %v1247_v60 = vpop.permute.xlu0 %1246 }
0x219a   :  { %v1249_v62 = vmul.f32 %v1247_v60, %v1236_v61 }
0x219c   :  { %1251 = vrot.lane.b32.xlu2 %v1249_v62, %s1749_s16 }
0x21f6   :  { %v1252_v2 = vpop.permute.xlu2 %1251 }
0x21f7   :  { %v1254_v5 = vadd.f32 %v1252_v2, %v1244_v1 }
0x21f9   :  { %1256 = vrot.lane.b32.xlu0 %v1254_v5, %s1750_s17 }
0x226b   :  { %v1257_v7 = vpop.permute.xlu0 %1256 }
0x226c   :  { %1259 = vst.msk [vmem:[#allocation5] sm:$0xff] %vm58_vm0, %v1257_v7 }
0x2273   :  { %v1260_v9 = vld [vmem:[#allocation5] sm:$0xff] }
0x2274   :  { %1692 = vtanh.f32 %v1260_v9 }
0x227a   :  { %v1693_v10 = vpop.eup %1692 }
0x227b   :  { %1263 = vrot.lane.b32.xlu1 %v1693_v10, %s1750_s17 }
0x2283   :  { %1320 = vrot.lane.b32.xlu1 %v1260_v9, %s1749_s16 }
0x22ed   :  { %v1264_v12 = vpop.permute.xlu1 %1263 }
0x22ee   :  { %v1266_v13 = vmul.f32 %v1264_v12, %v1236_v61 }
0x22f0   :  { %1268 = vrot.lane.b32.xlu2 %v1266_v13, %s1749_s16 }
0x22f5   :  { %v1321_v31 = vpop.permute.xlu1 %1320 }
0x234a   :  { %v1269_v14 = vpop.permute.xlu2 %1268 }
0x234b   :  { %1271 = vst.msk [vmem:[#allocation4] sm:$0xff] %vm58_vm0, %v1269_v14 }
0x2352   :  { %v1273_v15 = vld [vmem:[#allocation4] sm:$0xff] }
0x2353   :  { %1574 = vmatmul.msk.f32.vlgmr.msra.gmra.mxu2 %vm58_vm0, %v1273_v15  ;;  %v864_v15 = vpop.f32.mrf.mxu3 }
0x2354   :  { %v865_v16 = vadd.f32 %v2027_v41, %v864_v15 }
0x23d6   :  { %v1294_v18 = vpop.f32.mrf.mxu2 }
0x23d7   :  { %v1297_v19 = vadd.f32 %v1294_v18, %v859_v17 }
0x23d9   :  { %1694 = vtanh.f32 %v1297_v19  ;;  %v1575_v21 = vmul.f32 -1.442695, %v1297_v19 }
0x23db   :  { %1696 = vpow2.f32 %v1575_v21 }
0x23df   :  { %v1695_v20 = vpop.eup %1694 }
0x23e0   :  { %1325 = vrot.lane.b32.xlu0 %v1695_v20, %s1748_s15 }
0x23e1   :  { %v1697_v11 = vpop.eup %1696 }
0x23e2   :  { %v1301_v22 = vadd.f32 1.0, %v1697_v11 }
0x23e4   :  { %1698 = vrcp.f32 %v1301_v22  ;;  %v1313_v25 = vand.u32 2147483648, %v1301_v22  ;;  %vm1307_vm9 = vweird.f32 %v1301_v22  ;;  %v1311_v3 = vand.u32 2147483647, %v1301_v22 }
0x23e6   :  { %v1314_v27 = vor.u32 1.1754944e-38, %v1313_v25  ;;  %vm1312_vm11 = vcmp.eq.f32.partialorder %v1311_v3, 8.507059e+37 }
0x23ea   :  { %v1699_v23 = vpop.eup %1698 }
0x23eb   :  { %v1303_v36 = vmul.f32 %v1699_v23, %v1301_v22  ;;  %vm1308_vm8 = vweird.f32 %v1699_v23 }
0x23ec   :  { %vm1309_vm10 = vmor %vm1307_vm9, %vm1308_vm8 }
0x23ed   :  { %v1304_v37 = vsub.f32 1.0, %v1303_v36 }
0x23ef   :  { %v1305_v24 = vmul.f32 %v1699_v23, %v1304_v37 }
0x23f1   :  { %v1306_v38 = vadd.f32 %v1699_v23, %v1305_v24 }
0x23f3   :  { %v1310_v26 = vsel %vm1309_vm10, %v1699_v23, %v1306_v38 }
0x23f4   :  { %v1315_v29 = vsel %vm1312_vm11, %v1314_v27, %v1310_v26 }
0x23f5   :  { %v1323_v32 = vmul.f32 %v1321_v31, %v1315_v29 }
0x2452   :  { %v1326_v28 = vpop.permute.xlu0 %1325 }
0x2453   :  { %v1328_v30 = vmul.f32 %v1326_v28, %v1315_v29 }
0x2455   :  { %1330 = vrot.lane.b32.xlu2 %v1328_v30, %s1749_s16 }
0x24af   :  { %v1331_v33 = vpop.permute.xlu2 %1330 }
0x24b0   :  { %v1333_v34 = vadd.f32 %v1331_v33, %v1323_v32 }
0x24b2   :  { %1335 = vrot.lane.b32.xlu0 %v1333_v34, %s1750_s17 }
0x2524   :  { %v1336_v35 = vpop.permute.xlu0 %1335 }
0x2525   :  { %1338 = vst.msk [vmem:[#allocation5] sm:$0xff] %vm58_vm0, %v1336_v35 }
0x252c   :  { %v1339_v4 = vld [vmem:[#allocation5] sm:$0xff] }
0x252d   :  { %1700 = vtanh.f32 %v1339_v4 }
0x2533   :  { %v1701_v6 = vpop.eup %1700 }
0x2534   :  { %1342 = vrot.lane.b32.xlu1 %v1701_v6, %s1750_s17 }
0x253c   :  { %1399 = vrot.lane.b32.xlu1 %v1339_v4, %s1749_s16 }
0x25a6   :  { %v1343_v39 = vpop.permute.xlu1 %1342 }
0x25a7   :  { %v1345_v40 = vmul.f32 %v1343_v39, %v1315_v29 }
0x25a9   :  { %1347 = vrot.lane.b32.xlu2 %v1345_v40, %s1749_s16  ;;  %v1589_v40 = vld [vmem:[%s2133_s4] ss:$0 sm:$0xff] }
0x25ae   :  { %v1400_v62 = vpop.permute.xlu1 %1399 }
0x2603   :  { %v1348_v8 = vpop.permute.xlu2 %1347 }
0x2604   :  { %1350 = vst.msk [vmem:[#allocation4] sm:$0xff] %vm58_vm0, %v1348_v8 }
0x260b   :  { %v1352_v0 = vld [vmem:[#allocation4] sm:$0xff] }
0x260c   :  { %1576 = vmatmul.msk.f32.vlgmr.msrb.gmra.mxu1 %vm58_vm0, %v1352_v0 }
0x2689   :  { %v1373_v44 = vpop.f32.mrf.mxu1 }
0x268a   :  { %v1376_v45 = vadd.f32 %v1373_v44, %v862_v43  ;;  %v1519_v43 = vstv %s2134_s5 }
0x268c   :  { %1702 = vtanh.f32 %v1376_v45  ;;  %v1577_v47 = vmul.f32 -1.442695, %v1376_v45 }
0x268e   :  { %1704 = vpow2.f32 %v1577_v47 }
0x2692   :  { %v1703_v46 = vpop.eup %1702 }
0x2693   :  { %1404 = vrot.lane.b32.xlu0 %v1703_v46, %s1748_s15 }
0x2694   :  { %v1705_v48 = vpop.eup %1704 }
0x2695   :  { %v1380_v49 = vadd.f32 1.0, %v1705_v48 }
0x2697   :  { %1706 = vrcp.f32 %v1380_v49  ;;  %v1392_v55 = vand.u32 2147483648, %v1380_v49  ;;  %vm1386_vm13 = vweird.f32 %v1380_v49  ;;  %v1390_v56 = vand.u32 2147483647, %v1380_v49 }
0x2699   :  { %v1393_v58 = vor.u32 1.1754944e-38, %v1392_v55  ;;  %vm1391_vm15 = vcmp.eq.f32.partialorder %v1390_v56, 8.507059e+37 }
0x269d   :  { %v1707_v50 = vpop.eup %1706 }
0x269e   :  { %v1382_v51 = vmul.f32 %v1707_v50, %v1380_v49  ;;  %vm1387_vm12 = vweird.f32 %v1707_v50 }
0x269f   :  { %vm1388_vm14 = vmor %vm1386_vm13, %vm1387_vm12 }
0x26a0   :  { %v1383_v52 = vsub.f32 1.0, %v1382_v51 }
0x26a2   :  { %v1384_v53 = vmul.f32 %v1707_v50, %v1383_v52 }
0x26a4   :  { %v1385_v54 = vadd.f32 %v1707_v50, %v1384_v53 }
0x26a6   :  { %v1389_v57 = vsel %vm1388_vm14, %v1707_v50, %v1385_v54 }
0x26a7   :  { %v1394_v60 = vsel %vm1391_vm15, %v1393_v58, %v1389_v57 }
0x26a8   :  { %v1402_v63 = vmul.f32 %v1400_v62, %v1394_v60 }
0x2705   :  { %v1405_v59 = vpop.permute.xlu0 %1404 }
0x2706   :  { %v1407_v61 = vmul.f32 %v1405_v59, %v1394_v60 }
0x2708   :  { %1409 = vrot.lane.b32.xlu2 %v1407_v61, %s1749_s16 }
0x2762   :  { %v1410_v1 = vpop.permute.xlu2 %1409 }
0x2763   :  { %v1412_v2 = vadd.f32 %v1410_v1, %v1402_v63 }
0x2765   :  { %1414 = vrot.lane.b32.xlu0 %v1412_v2, %s1750_s17 }
0x27d7   :  { %v1415_v5 = vpop.permute.xlu0 %1414 }
0x27d8   :  { %1417 = vst.msk [vmem:[#allocation5] sm:$0xff] %vm58_vm0, %v1415_v5 }
0x27df   :  { %v1418_v7 = vld [vmem:[#allocation5] sm:$0xff] }
0x27e0   :  { %1708 = vtanh.f32 %v1418_v7 }
0x27e6   :  { %v1709_v9 = vpop.eup %1708 }
0x27e7   :  { %1421 = vrot.lane.b32.xlu1 %v1709_v9, %s1750_s17 }
0x27ef   :  { %1478 = vrot.lane.b32.xlu1 %v1418_v7, %s1749_s16 }
0x2859   :  { %v1422_v10 = vpop.permute.xlu1 %1421 }
0x285a   :  { %v1424_v12 = vmul.f32 %v1422_v10, %v1394_v60 }
0x285c   :  { %1426 = vrot.lane.b32.xlu2 %v1424_v12, %s1749_s16 }
0x2861   :  { %v1479_v29 = vpop.permute.xlu1 %1478 }
0x28b6   :  { %v1427_v13 = vpop.permute.xlu2 %1426 }
0x28b7   :  { %1429 = vst.msk [vmem:[#allocation4] sm:$0xff] %vm58_vm0, %v1427_v13 }
0x28be   :  { %v1431_v14 = vld [vmem:[#allocation4] sm:$0xff] }
0x28bf   :  { %1578 = vmatmul.msk.f32.vlgmr.msrb.gmra.mxu2 %vm58_vm0, %v1431_v14 }
0x2942   :  { %v1452_v17 = vpop.f32.mrf.mxu2 }
0x2943   :  { %v1455_v18 = vadd.f32 %v1452_v17, %v865_v16 }
0x2945   :  { %1710 = vtanh.f32 %v1455_v18  ;;  %v1579_v20 = vmul.f32 -1.442695, %v1455_v18 }
0x2947   :  { %1712 = vpow2.f32 %v1579_v20 }
0x294b   :  { %v1711_v19 = vpop.eup %1710 }
0x294c   :  { %1483 = vrot.lane.b32.xlu0 %v1711_v19, %s1748_s15 }
0x294d   :  { %v1713_v21 = vpop.eup %1712 }
0x294e   :  { %v1459_v11 = vadd.f32 1.0, %v1713_v21 }
0x2950   :  { %1714 = vrcp.f32 %v1459_v11  ;;  %v1471_v38 = vand.u32 2147483648, %v1459_v11  ;;  %vm1465_vm2 = vweird.f32 %v1459_v11  ;;  %v1469_v41 = vand.u32 2147483647, %v1459_v11 }
0x2952   :  { %v1472_v3 = vor.u32 1.1754944e-38, %v1471_v38  ;;  %vm1470_vm4 = vcmp.eq.f32.partialorder %v1469_v41, 8.507059e+37 }
0x2956   :  { %v1715_v22 = vpop.eup %1714 }
0x2957   :  { %v1461_v23 = vmul.f32 %v1715_v22, %v1459_v11  ;;  %vm1466_vm1 = vweird.f32 %v1715_v22 }
0x2958   :  { %vm1467_vm3 = vmor %vm1465_vm2, %vm1466_vm1 }
0x2959   :  { %v1462_v36 = vsub.f32 1.0, %v1461_v23 }
0x295b   :  { %v1463_v37 = vmul.f32 %v1715_v22, %v1462_v36 }
0x295d   :  { %v1464_v24 = vadd.f32 %v1715_v22, %v1463_v37 }
0x295f   :  { %v1468_v25 = vsel %vm1467_vm3, %v1715_v22, %v1464_v24 }
0x2960   :  { %v1473_v27 = vsel %vm1470_vm4, %v1472_v3, %v1468_v25 }
0x2961   :  { %v1481_v30 = vmul.f32 %v1479_v29, %v1473_v27 }
0x29be   :  { %v1484_v26 = vpop.permute.xlu0 %1483 }
0x29bf   :  { %v1486_v28 = vmul.f32 %v1484_v26, %v1473_v27 }
0x29c1   :  { %1488 = vrot.lane.b32.xlu2 %v1486_v28, %s1749_s16 }
0x2a1b   :  { %v1489_v31 = vpop.permute.xlu2 %1488 }
0x2a1c   :  { %v1491_v32 = vadd.f32 %v1489_v31, %v1481_v30 }
0x2a1e   :  { %1493 = vrot.lane.b32.xlu0 %v1491_v32, %s1750_s17 }
0x2a90   :  { %v1494_v33 = vpop.permute.xlu0 %1493 }
0x2a91   :  { %1496 = vst.msk [vmem:[#allocation5] sm:$0xff] %vm58_vm0, %v1494_v33 }
0x2a98   :  { %v1497_v34 = vld [vmem:[#allocation5] sm:$0xff] }
0x2a99   :  { %1716 = vtanh.f32 %v1497_v34 }
0x2a9f   :  { %v1717_v35 = vpop.eup %1716 }
0x2aa0   :  { %1500 = vrot.lane.b32.xlu1 %v1717_v35, %s1750_s17 }
0x2b12   :  { %v1501_v4 = vpop.permute.xlu1 %1500 }
0x2b13   :  { %v1503_v6 = vmul.f32 %v1501_v4, %v1473_v27 }
0x2b15   :  { %1505 = vrot.lane.b32.xlu2 %v1503_v6, %s1749_s16 }
0x2b6f   :  { %v1506_v39 = vpop.permute.xlu2 %1505 }
0x2b70   :  { %1508 = vst.msk [vmem:[#allocation4] sm:$0xff] %vm58_vm0, %v1506_v39 }
0x2b77   :  { %v1509_v8 = vld [vmem:[#allocation4] sm:$0xff] }
0x2b78   :  { %v1514_v0 = vmul.f32 %v1589_v40, %v1509_v8 }
0x2b7a   :  { %v1515_v42 = vsel %vm58_vm0, %v1514_v0, 0.0 }
0x2b7b   :  { %1516 = vadd.xlane.f32.xlu0 %v1515_v42 }
0x2bee   :  { %v1517_v44 = vpop.xlane.xlu0 %1516 }
0x2bef   :  { %v1520_v45 = vadd.f32 %v1519_v43, %v1517_v44 }
0x2bf1   :  { %1522 = vst.msk [vmem:[%s2135_s6] sm:$0xff] %vm1521_vm5, %v1520_v45 }
0x2bf2   :  { %1527 = vsyncpa [#allocation8], 1 }

</bundles_post_ra>
